<compile_context>
chip_gen: v6e
topology: v6e:2x2x1
jax: 0.10.0
libtpu: 0.0.40
codegen_flags: <defaults>
</compile_context>

<pallas_src>
import math
import functools

import jax
import jax.numpy as jnp
from jax import lax
from jax.experimental import pallas as pl
from jax.experimental.pallas import tpu as pltpu

LN_EPS = 1e-5          # PyTorch nn.LayerNorm default eps
NEG_INF = -1e9         # additive key-padding mask value


# ----------------------------------------------------------------------------------
# small helpers
# ----------------------------------------------------------------------------------
def _round_up(x, m):
    return ((x + m - 1) // m) * m


def _row_tile(m):
    """m is a multiple of 8; pick the largest tile <= 512 that divides it."""
    for t in (512, 256, 128, 64, 32, 16, 8):
        if m % t == 0:
            return t
    return m


def _pad_rows(x, mp):
    m = x.shape[0]
    if mp == m:
        return x
    return jnp.pad(x, ((0, mp - m), (0, 0)))


def _parallel(n):
    return pltpu.CompilerParams(dimension_semantics=("parallel",) * n)


# ----------------------------------------------------------------------------------
# kernels
# ----------------------------------------------------------------------------------
def _linear_kernel(x_ref, w_ref, b_ref, o_ref, *, activation):
    """y = x @ W + b (bf16 operands, f32 accumulate), optional ReLU."""
    x = x_ref[...].astype(jnp.bfloat16)
    w = w_ref[...].astype(jnp.bfloat16)
    y = jnp.dot(x, w, preferred_element_type=jnp.float32) + b_ref[...]
    if activation == "relu":
        y = jnp.maximum(y, 0.0)
    o_ref[...] = y.astype(o_ref.dtype)


def _attention_kernel(q_ref, k_ref, v_ref, m_ref, o_ref, *, scale):
    """One (batch, head): softmax(q k^T * scale + mask) @ v, softmax in f32."""
    q = q_ref[...].astype(jnp.bfloat16)                       # (Sq, dh)
    k = k_ref[...].astype(jnp.bfloat16)                       # (Sk, dh)
    s = lax.dot_general(q, k, (((1,), (1,)), ((), ())),
                        preferred_element_type=jnp.float32)   # (Sq, Sk)
    s = s * scale + m_ref[...]                                # (1, Sk) additive mask
    s_max = jnp.max(s, axis=-1, keepdims=True)
    p = jnp.exp(s - s_max)
    denom = jnp.sum(p, axis=-1, keepdims=True)
    p = p * pl.reciprocal(denom, approx=True)
    out = jnp.dot(p.astype(jnp.bfloat16), v_ref[...].astype(jnp.bfloat16),
                  preferred_element_type=jnp.float32)
    o_ref[...] = out.astype(o_ref.dtype)


def _resid_linear_ln_kernel(x_ref, res_ref, w_ref, p_ref, o_ref):
    """y = LayerNorm(res + x @ W + b); p_ref rows = [bias, gamma, beta]."""
    x = x_ref[...].astype(jnp.bfloat16)
    w = w_ref[...].astype(jnp.bfloat16)
    y = jnp.dot(x, w, preferred_element_type=jnp.float32)
    y = y + p_ref[0:1, :] + res_ref[...]
    mean = jnp.mean(y, axis=-1, keepdims=True)
    var = jnp.mean(jnp.square(y - mean), axis=-1, keepdims=True)
    y = (y - mean) * lax.rsqrt(var + LN_EPS)
    o_ref[...] = (y * p_ref[1:2, :] + p_ref[2:3, :]).astype(o_ref.dtype)


def _ffn_ln_kernel(x_ref, w1_ref, b1_ref, w2_ref, p_ref, o_ref, *, activation):
    """y = LayerNorm(x + act(x@W1+b1) @ W2 + b2); p_ref rows = [b2, gamma, beta]."""
    x = x_ref[...]
    h = jnp.dot(x.astype(jnp.bfloat16), w1_ref[...].astype(jnp.bfloat16),
                preferred_element_type=jnp.float32) + b1_ref[...]
    if activation == "relu":
        h = jnp.maximum(h, 0.0)
    else:  # 'gelu'
        h = jax.nn.gelu(h)
    y = jnp.dot(h.astype(jnp.bfloat16), w2_ref[...].astype(jnp.bfloat16),
                preferred_element_type=jnp.float32)
    y = y + p_ref[0:1, :] + x
    mean = jnp.mean(y, axis=-1, keepdims=True)
    var = jnp.mean(jnp.square(y - mean), axis=-1, keepdims=True)
    y = (y - mean) * lax.rsqrt(var + LN_EPS)
    o_ref[...] = (y * p_ref[1:2, :] + p_ref[2:3, :]).astype(o_ref.dtype)


def _layernorm_kernel(x_ref, p_ref, o_ref):
    """y = LayerNorm(x); p_ref rows = [gamma, beta]."""
    y = x_ref[...]
    mean = jnp.mean(y, axis=-1, keepdims=True)
    var = jnp.mean(jnp.square(y - mean), axis=-1, keepdims=True)
    y = (y - mean) * lax.rsqrt(var + LN_EPS)
    o_ref[...] = (y * p_ref[0:1, :] + p_ref[1:2, :]).astype(o_ref.dtype)


# ----------------------------------------------------------------------------------
# pallas_call wrappers (row-tiled over the token axis, weights held resident)
# ----------------------------------------------------------------------------------
def linear(x, w, b, activation=None):
    """x: (M, K); w: (K, N) already stored in (in, out) layout; b: (N,)."""
    M, K = x.shape
    Nout = w.shape[1]
    Mp = _round_up(M, 8)
    xp = _pad_rows(x, Mp)
    tm = _row_tile(Mp)
    out = pl.pallas_call(
        functools.partial(_linear_kernel, activation=activation),
        out_shape=jax.ShapeDtypeStruct((Mp, Nout), jnp.float32),
        grid=(Mp // tm,),
        in_specs=[
            pl.BlockSpec((tm, K), lambda i: (i, 0)),
            pl.BlockSpec((K, Nout), lambda i: (0, 0)),
            pl.BlockSpec((1, Nout), lambda i: (0, 0)),
        ],
        out_specs=pl.BlockSpec((tm, Nout), lambda i: (i, 0)),
        compiler_params=_parallel(1),
        cost_estimate=pl.CostEstimate(
            flops=2 * Mp * K * Nout, transcendentals=0,
            bytes_accessed=4 * (Mp * K + K * Nout + Mp * Nout)),
    )(xp, w, b.reshape(1, Nout))
    return out[:M]


def attention_core(q4, k4, v4, add_mask, scale):
    """q4: (N,H,Sq,dh), k4/v4: (N,H,Sk,dh), add_mask: (N,1,Sk) additive f32."""
    N, H, Sq, dh = q4.shape
    Sk = k4.shape[2]
    out = pl.pallas_call(
        functools.partial(_attention_kernel, scale=scale),
        out_shape=jax.ShapeDtypeStruct((N, H, Sq, dh), jnp.float32),
        grid=(N, H),
        in_specs=[
            pl.BlockSpec((None, None, Sq, dh), lambda n, h: (n, h, 0, 0)),
            pl.BlockSpec((None, None, Sk, dh), lambda n, h: (n, h, 0, 0)),
            pl.BlockSpec((None, None, Sk, dh), lambda n, h: (n, h, 0, 0)),
            pl.BlockSpec((None, 1, Sk), lambda n, h: (n, 0, 0)),
        ],
        out_specs=pl.BlockSpec((None, None, Sq, dh), lambda n, h: (n, h, 0, 0)),
        compiler_params=_parallel(2),
        cost_estimate=pl.CostEstimate(
            flops=4 * N * H * Sq * Sk * dh,
            transcendentals=N * H * Sq * Sk,
            bytes_accessed=4 * N * H * (2 * Sq * dh + 2 * Sk * dh + Sk)),
    )(q4, k4, v4, add_mask)
    return out


def resid_linear_ln(x2d, res2d, w, pack):
    M, E = x2d.shape
    Mp = _round_up(M, 8)
    xp, rp = _pad_rows(x2d, Mp), _pad_rows(res2d, Mp)
    tm = _row_tile(Mp)
    out = pl.pallas_call(
        _resid_linear_ln_kernel,
        out_shape=jax.ShapeDtypeStruct((Mp, E), jnp.float32),
        grid=(Mp // tm,),
        in_specs=[
            pl.BlockSpec((tm, E), lambda i: (i, 0)),
            pl.BlockSpec((tm, E), lambda i: (i, 0)),
            pl.BlockSpec((E, E), lambda i: (0, 0)),
            pl.BlockSpec((3, E), lambda i: (0, 0)),
        ],
        out_specs=pl.BlockSpec((tm, E), lambda i: (i, 0)),
        compiler_params=_parallel(1),
        cost_estimate=pl.CostEstimate(
            flops=2 * Mp * E * E + 8 * Mp * E, transcendentals=Mp,
            bytes_accessed=4 * (3 * Mp * E + E * E)),
    )(xp, rp, w, pack)
    return out[:M]


def ffn_resid_ln(x2d, w1, b1, w2, pack, activation):
    M, E = x2d.shape
    F = w1.shape[1]
    Mp = _round_up(M, 8)
    xp = _pad_rows(x2d, Mp)
    tm = _row_tile(Mp)
    out = pl.pallas_call(
        functools.partial(_ffn_ln_kernel, activation=activation),
        out_shape=jax.ShapeDtypeStruct((Mp, E), jnp.float32),
        grid=(Mp // tm,),
        in_specs=[
            pl.BlockSpec((tm, E), lambda i: (i, 0)),
            pl.BlockSpec((E, F), lambda i: (0, 0)),
            pl.BlockSpec((1, F), lambda i: (0, 0)),
            pl.BlockSpec((F, E), lambda i: (0, 0)),
            pl.BlockSpec((3, E), lambda i: (0, 0)),
        ],
        out_specs=pl.BlockSpec((tm, E), lambda i: (i, 0)),
        compiler_params=_parallel(1),
        cost_estimate=pl.CostEstimate(
            flops=4 * Mp * E * F + 8 * Mp * E, transcendentals=Mp,
            bytes_accessed=4 * (2 * Mp * E + 2 * E * F)),
    )(xp, w1, b1.reshape(1, F), w2, pack)
    return out[:M]


def layer_norm(x2d, pack):
    M, E = x2d.shape
    Mp = _round_up(M, 8)
    xp = _pad_rows(x2d, Mp)
    tm = _row_tile(Mp)
    out = pl.pallas_call(
        _layernorm_kernel,
        out_shape=jax.ShapeDtypeStruct((Mp, E), jnp.float32),
        grid=(Mp // tm,),
        in_specs=[
            pl.BlockSpec((tm, E), lambda i: (i, 0)),
            pl.BlockSpec((2, E), lambda i: (0, 0)),
        ],
        out_specs=pl.BlockSpec((tm, E), lambda i: (i, 0)),
        compiler_params=_parallel(1),
    )(xp, pack)
    return out[:M]


# ----------------------------------------------------------------------------------
# model building blocks (JAX glue around the kernels)
# ----------------------------------------------------------------------------------
def mha_block(x_q, x_kv, resid2d, attn_p, out_pack, nhead, key_padding_mask, is_self):
    """Multi-head attention, then fused out-proj + residual + LayerNorm.

    x_q: (Sq, N, E) queries; x_kv: (Sk, N, E) keys/values; resid2d: (Sq*N, E).
    Returns the post-norm activation, shape (Sq*N, E).
    """
    Sq, N, E = x_q.shape
    Sk = x_kv.shape[0]
    H = nhead
    dh = E // H
    q2d = x_q.reshape(Sq * N, E)
    if is_self:
        qkv = linear(q2d, attn_p["w_in"], attn_p["b_in"])            # (Sq*N, 3E)
        q, kf, vf = qkv[:, :E], qkv[:, E:2 * E], qkv[:, 2 * E:]
    else:
        q = linear(q2d, attn_p["w_in"][:, :E], attn_p["b_in"][:E])
        kv = linear(x_kv.reshape(Sk * N, E),
                    attn_p["w_in"][:, E:], attn_p["b_in"][E:])        # (Sk*N, 2E)
        kf, vf = kv[:, :E], kv[:, E:]

    # split heads: (S, N, E) -> (N, H, S, dh), matching torch's view/transpose order
    q4 = q.reshape(Sq, N, H, dh).transpose(1, 2, 0, 3)
    k4 = kf.reshape(Sk, N, H, dh).transpose(1, 2, 0, 3)
    v4 = vf.reshape(Sk, N, H, dh).transpose(1, 2, 0, 3)

    if key_padding_mask is None:
        add_mask = jnp.zeros((N, 1, Sk), jnp.float32)
    else:  # True = masked-out key position (PyTorch convention)
        add_mask = jnp.where(key_padding_mask, NEG_INF, 0.0).astype(jnp.float32)
        add_mask = add_mask.reshape(N, 1, Sk)

    attn4 = attention_core(q4, k4, v4, add_mask, 1.0 / math.sqrt(dh))
    attn2d = attn4.transpose(2, 0, 1, 3).reshape(Sq * N, E)
    # fused: out_proj + residual add + post-attention LayerNorm
    return resid_linear_ln(attn2d, resid2d, attn_p["w_out"], out_pack)


def encoder_layer_fwd(src, p, nhead, activation, src_kpm):
    S, N, E = src.shape
    src2d = src.reshape(S * N, E)
    h = mha_block(src, src, src2d, p["attn"], p["pack1"], nhead, src_kpm, True)
    h = ffn_resid_ln(h, p["w1"], p["b1"], p["w2"], p["pack2"], activation)
    return h.reshape(S, N, E)


def decoder_layer_fwd(tgt, memory, p, nhead, activation, tgt_kpm):
    T, N, E = tgt.shape
    tgt2d = tgt.reshape(T * N, E)
    h2d = mha_block(tgt, tgt, tgt2d, p["self_attn"], p["pack1"], nhead, tgt_kpm, True)
    h2d = mha_block(h2d.reshape(T, N, E), memory, h2d, p["cross_attn"], p["pack2"],
                    nhead, None, False)
    h2d = ffn_resid_ln(h2d, p["w1"], p["b1"], p["w2"], p["pack3"], activation)
    return h2d.reshape(T, N, E)


# ----------------------------------------------------------------------------------
# parameter init (matches nn.Transformer: xavier_uniform on all weight matrices)
# ----------------------------------------------------------------------------------
def _xavier(key, shape):
    fan_in, fan_out = shape
    a = math.sqrt(6.0 / (fan_in + fan_out))
    return jax.random.uniform(key, shape, jnp.float32, -a, a)


def _ln_rows(E):
    return jnp.concatenate([jnp.ones((1, E), jnp.float32),
                            jnp.zeros((1, E), jnp.float32)], axis=0)


def _pack3(bias, E):
    return jnp.concatenate([bias.reshape(1, E),
                            jnp.ones((1, E), jnp.float32),
                            jnp.zeros((1, E), jnp.float32)], axis=0)


def _init_mha(key, E):
    k1, k2 = jax.random.split(key)
    params = dict(
        w_in=_xavier(k1, (E, 3 * E)),            # stored as (in, out) = torch weight^T
        b_in=jnp.zeros((3 * E,), jnp.float32),
        w_out=_xavier(k2, (E, E)),
    )
    b_out = jnp.zeros((E,), jnp.float32)
    return params, b_out


def _init_ffn(key, E, F):
    k1, k2, k3, k4 = jax.random.split(key, 4)
    w1 = _xavier(k1, (E, F))
    b1 = jax.random.uniform(k2, (F,), jnp.float32,
                            -1.0 / math.sqrt(E), 1.0 / math.sqrt(E))
    w2 = _xavier(k3, (F, E))
    b2 = jax.random.uniform(k4, (E,), jnp.float32,
                            -1.0 / math.sqrt(F), 1.0 / math.sqrt(F))
    return w1, b1, w2, b2


def _init_encoder_layer(key, E, F):
    k1, k2 = jax.random.split(key)
    attn, b_out = _init_mha(k1, E)
    w1, b1, w2, b2 = _init_ffn(k2, E, F)
    return dict(attn=attn, pack1=_pack3(b_out, E),
                w1=w1, b1=b1, w2=w2, pack2=_pack3(b2, E))


def _init_decoder_layer(key, E, F):
    k1, k2, k3 = jax.random.split(key, 3)
    sa, sa_bout = _init_mha(k1, E)
    ca, ca_bout = _init_mha(k2, E)
    w1, b1, w2, b2 = _init_ffn(k3, E, F)
    return dict(self_attn=sa, pack1=_pack3(sa_bout, E),
                cross_attn=ca, pack2=_pack3(ca_bout, E),
                w1=w1, b1=b1, w2=w2, pack3=_pack3(b2, E))


class TransformerPallas:
    """Pallas forward-pass equivalent of the PyTorch `Transformer` wrapper
    (nn.Transformer: post-LN encoder/decoder stacks + final LayerNorms)."""

    def __init__(self, model_name, input_size, num_enc_layers, num_dec_layers,
                 norm=None, nhead=8, dim_feedforward=2048, dropout=0.1,
                 activation='relu', device=None, key=None):
        assert input_size % nhead == 0
        self.model_name = model_name + '_transformer'
        self.input_size = input_size
        self.nhead = nhead
        self.activation = activation
        # TODO(synk): dropout (p=dropout in PyTorch train mode) is treated as identity
        # (inference semantics); no PRNG-dropout path inside the kernels.
        E, F = input_size, dim_feedforward
        keys = jax.random.split(key, num_enc_layers + num_dec_layers)
        self.enc_layers = [_init_encoder_layer(keys[i], E, F)
                           for i in range(num_enc_layers)]
        self.dec_layers = [_init_decoder_layer(keys[num_enc_layers + i], E, F)
                           for i in range(num_dec_layers)]
        # nn.Transformer always builds a final LayerNorm for encoder and decoder.
        self.enc_norm = _ln_rows(E)
        self.dec_norm = _ln_rows(E)

    def __call__(self, source, targ, src_key_padding_mask=None,
                 tgt_key_padding_mask=None):
        # source: (S, N, E), targ: (T, N, E)   (seq-first, as in nn.Transformer)
        x = source
        for p in self.enc_layers:
            x = encoder_layer_fwd(x, p, self.nhead, self.activation,
                                  src_key_padding_mask)
        S, N, E = x.shape
        memory = layer_norm(x.reshape(S * N, E), self.enc_norm).reshape(S, N, E)

        y = targ
        for p in self.dec_layers:
            y = decoder_layer_fwd(y, memory, p, self.nhead, self.activation,
                                  tgt_key_padding_mask)
        T = y.shape[0]
        out = layer_norm(y.reshape(T * N, E), self.dec_norm).reshape(T, N, E)
        return out


if __name__ == "__main__":
    key = jax.random.PRNGKey(0)
    key, pk, sk, tk = jax.random.split(key, 4)

    d_model, nhead, dff = 32, 8, 64
    num_enc, num_dec = 2, 2
    S, T, N = 8, 8, 2   # (src seq, tgt seq, batch)

    model = TransformerPallas("demo", d_model, num_enc, num_dec,
                              nhead=nhead, dim_feedforward=dff,
                              dropout=0.1, activation='relu', key=pk)

    src = jax.random.normal(sk, (S, N, d_model), jnp.float32)
    tgt = jax.random.normal(tk, (T, N, d_model), jnp.float32)

    fwd = jax.jit(lambda s, t: model(s, t))
    out = jax.block_until_ready(fwd(src, tgt))

    assert out.shape == (T, N, d_model), out.shape
    assert bool(jnp.all(jnp.isfinite(out)))
    print("KERNEL_OK")
</pallas_src>

<mosaic_0001>
module attributes {stable_mosaic.version = 11 : i64} {
  func.func @_linear_kernel(%arg0: i32, %arg1: memref<16x32xf32, #tpu.memory_space<vmem>>, %arg2: memref<32x96xf32, #tpu.memory_space<vmem>>, %arg3: memref<1x96xf32, #tpu.memory_space<vmem>>, %arg4: memref<16x96xf32, #tpu.memory_space<vmem>>) attributes {dimension_semantics = [#tpu.dimension_semantics<parallel>], iteration_bounds = array<i64: 1>, scalar_prefetch = 0 : i64, scratch_operands = 0 : i64, tpu.core_type = #tpu.core_type<tc>, window_params = [{transform_indices = @transform_0, window_bounds = array<i64: 16, 32>}, {pipeline_mode = #tpu.pipeline_mode<synchronous>, transform_indices = @transform_1, window_bounds = array<i64: 32, 96>}, {pipeline_mode = #tpu.pipeline_mode<synchronous>, transform_indices = @transform_2, window_bounds = array<i64: 1, 96>}, {transform_indices = @transform_3, window_bounds = array<i64: 16, 96>}]} {
    %c0 = arith.constant 0 : index
    %c0_0 = arith.constant 0 : index
    %0 = vector.load %arg1[%c0, %c0_0] : memref<16x32xf32, #tpu.memory_space<vmem>>, vector<16x32xf32>
    %1 = arith.truncf %0 : vector<16x32xf32> to vector<16x32xbf16>
    %c0_1 = arith.constant 0 : index
    %c0_2 = arith.constant 0 : index
    %2 = vector.load %arg2[%c0_1, %c0_2] : memref<32x96xf32, #tpu.memory_space<vmem>>, vector<32x96xf32>
    %3 = arith.truncf %2 : vector<32x96xf32> to vector<32x96xbf16>
    %cst = arith.constant dense<0.000000e+00> : vector<16x96xf32>
    %4 = tpu.matmul %1, %3, %cst {dimension_numbers = #tpu.dot_dimension_numbers<[1], [0], [0], [1], [0, 0, 1, 1], [], []>} : vector<16x32xbf16>, vector<32x96xbf16>, vector<16x96xf32> -> vector<16x96xf32>
    %c0_3 = arith.constant 0 : index
    %c0_4 = arith.constant 0 : index
    %5 = vector.load %arg3[%c0_3, %c0_4] : memref<1x96xf32, #tpu.memory_space<vmem>>, vector<1x96xf32>
    %6 = vector.broadcast %5 : vector<1x96xf32> to vector<16x96xf32>
    %7 = arith.addf %4, %6 : vector<16x96xf32>
    %c0_5 = arith.constant 0 : index
    %c0_6 = arith.constant 0 : index
    %8 = vector.load %arg4[%c0_5, %c0_6] : memref<16x96xf32, #tpu.memory_space<vmem>>, vector<16x96xf32>
    tpu.vector_store %arg4[%c0_5, %c0_6], %7 {strides = array<i32>} : memref<16x96xf32, #tpu.memory_space<vmem>>, vector<16x96xf32>,
    return
  }
  func.func @transform_0(%arg0: i32) -> (i32, i32) {
    %c0_i32 = arith.constant 0 : i32
    %c0_i32_0 = arith.constant 0 : i32
    return %arg0, %c0_i32 : i32, i32
  }
  func.func @transform_1(%arg0: i32) -> (i32, i32) {
    %c0_i32 = arith.constant 0 : i32
    %c0_i32_0 = arith.constant 0 : i32
    %c0_i32_1 = arith.constant 0 : i32
    return %c0_i32, %c0_i32_0 : i32, i32
  }
  func.func @transform_2(%arg0: i32) -> (i32, i32) {
    %c0_i32 = arith.constant 0 : i32
    %c0_i32_0 = arith.constant 0 : i32
    %c0_i32_1 = arith.constant 0 : i32
    return %c0_i32, %c0_i32_0 : i32, i32
  }
  func.func @transform_3(%arg0: i32) -> (i32, i32) {
    %c0_i32 = arith.constant 0 : i32
    %c0_i32_0 = arith.constant 0 : i32
    return %arg0, %c0_i32 : i32, i32
  }
}

module attributes {stable_mosaic.version = 11 : i64} {
  func.func @_linear_kernel(%arg0: i32, %arg1: memref<16x32xf32, #tpu.memory_space<vmem>>, %arg2: memref<32x32xf32, #tpu.memory_space<vmem>>, %arg3: memref<1x32xf32, #tpu.memory_space<vmem>>, %arg4: memref<16x32xf32, #tpu.memory_space<vmem>>) attributes {dimension_semantics = [#tpu.dimension_semantics<parallel>], iteration_bounds = array<i64: 1>, scalar_prefetch = 0 : i64, scratch_operands = 0 : i64, tpu.core_type = #tpu.core_type<tc>, window_params = [{transform_indices = @transform_0, window_bounds = array<i64: 16, 32>}, {pipeline_mode = #tpu.pipeline_mode<synchronous>, transform_indices = @transform_1, window_bounds = array<i64: 32, 32>}, {pipeline_mode = #tpu.pipeline_mode<synchronous>, transform_indices = @transform_2, window_bounds = array<i64: 1, 32>}, {transform_indices = @transform_3, window_bounds = array<i64: 16, 32>}]} {
    %c0 = arith.constant 0 : index
    %c0_0 = arith.constant 0 : index
    %0 = vector.load %arg1[%c0, %c0_0] : memref<16x32xf32, #tpu.memory_space<vmem>>, vector<16x32xf32>
    %1 = arith.truncf %0 : vector<16x32xf32> to vector<16x32xbf16>
    %c0_1 = arith.constant 0 : index
    %c0_2 = arith.constant 0 : index
    %2 = vector.load %arg2[%c0_1, %c0_2] : memref<32x32xf32, #tpu.memory_space<vmem>>, vector<32x32xf32>
    %3 = arith.truncf %2 : vector<32x32xf32> to vector<32x32xbf16>
    %cst = arith.constant dense<0.000000e+00> : vector<16x32xf32>
    %4 = tpu.matmul %1, %3, %cst {dimension_numbers = #tpu.dot_dimension_numbers<[1], [0], [0], [1], [0, 0, 1, 1], [], []>} : vector<16x32xbf16>, vector<32x32xbf16>, vector<16x32xf32> -> vector<16x32xf32>
    %c0_3 = arith.constant 0 : index
    %c0_4 = arith.constant 0 : index
    %5 = vector.load %arg3[%c0_3, %c0_4] : memref<1x32xf32, #tpu.memory_space<vmem>>, vector<1x32xf32>
    %6 = vector.broadcast %5 : vector<1x32xf32> to vector<16x32xf32>
    %7 = arith.addf %4, %6 : vector<16x32xf32>
    %c0_5 = arith.constant 0 : index
    %c0_6 = arith.constant 0 : index
    %8 = vector.load %arg4[%c0_5, %c0_6] : memref<16x32xf32, #tpu.memory_space<vmem>>, vector<16x32xf32>
    tpu.vector_store %arg4[%c0_5, %c0_6], %7 {strides = array<i32>} : memref<16x32xf32, #tpu.memory_space<vmem>>, vector<16x32xf32>,
    return
  }
  func.func @transform_0(%arg0: i32) -> (i32, i32) {
    %c0_i32 = arith.constant 0 : i32
    %c0_i32_0 = arith.constant 0 : i32
    return %arg0, %c0_i32 : i32, i32
  }
  func.func @transform_1(%arg0: i32) -> (i32, i32) {
    %c0_i32 = arith.constant 0 : i32
    %c0_i32_0 = arith.constant 0 : i32
    %c0_i32_1 = arith.constant 0 : i32
    return %c0_i32, %c0_i32_0 : i32, i32
  }
  func.func @transform_2(%arg0: i32) -> (i32, i32) {
    %c0_i32 = arith.constant 0 : i32
    %c0_i32_0 = arith.constant 0 : i32
    %c0_i32_1 = arith.constant 0 : i32
    return %c0_i32, %c0_i32_0 : i32, i32
  }
  func.func @transform_3(%arg0: i32) -> (i32, i32) {
    %c0_i32 = arith.constant 0 : i32
    %c0_i32_0 = arith.constant 0 : i32
    return %arg0, %c0_i32 : i32, i32
  }
}

module attributes {stable_mosaic.version = 11 : i64} {
  func.func @_attention_kernel(%arg0: i32, %arg1: i32, %arg2: memref<1x1x8x4xf32, #tpu.memory_space<vmem>>, %arg3: memref<1x1x8x4xf32, #tpu.memory_space<vmem>>, %arg4: memref<1x1x8x4xf32, #tpu.memory_space<vmem>>, %arg5: memref<1x1x8xf32, #tpu.memory_space<vmem>>, %arg6: memref<1x1x8x4xf32, #tpu.memory_space<vmem>>) attributes {dimension_semantics = [#tpu.dimension_semantics<parallel>, #tpu.dimension_semantics<parallel>], iteration_bounds = array<i64: 2, 8>, scalar_prefetch = 0 : i64, scratch_operands = 0 : i64, tpu.core_type = #tpu.core_type<tc>, window_params = [{transform_indices = @transform_0, window_bounds = array<i64: 1, 1, 8, 4>}, {transform_indices = @transform_1, window_bounds = array<i64: 1, 1, 8, 4>}, {transform_indices = @transform_2, window_bounds = array<i64: 1, 1, 8, 4>}, {transform_indices = @transform_3, window_bounds = array<i64: 1, 1, 8>}, {transform_indices = @transform_4, window_bounds = array<i64: 1, 1, 8, 4>}]} {
    %c0 = arith.constant 0 : index
    %c0_0 = arith.constant 0 : index
    %c0_1 = arith.constant 0 : index
    %c0_2 = arith.constant 0 : index
    %0 = vector.load %arg2[%c0, %c0_0, %c0_1, %c0_2] : memref<1x1x8x4xf32, #tpu.memory_space<vmem>>, vector<1x1x8x4xf32>
    %1 = vector.shape_cast %0 : vector<1x1x8x4xf32> to vector<8x4xf32>
    %2 = arith.truncf %1 : vector<8x4xf32> to vector<8x4xbf16>
    %c0_3 = arith.constant 0 : index
    %c0_4 = arith.constant 0 : index
    %c0_5 = arith.constant 0 : index
    %c0_6 = arith.constant 0 : index
    %3 = vector.load %arg3[%c0_3, %c0_4, %c0_5, %c0_6] : memref<1x1x8x4xf32, #tpu.memory_space<vmem>>, vector<1x1x8x4xf32>
    %4 = vector.shape_cast %3 : vector<1x1x8x4xf32> to vector<8x4xf32>
    %5 = arith.truncf %4 : vector<8x4xf32> to vector<8x4xbf16>
    %cst = arith.constant dense<0.000000e+00> : vector<8x8xf32>
    %6 = tpu.matmul %2, %5, %cst {dimension_numbers = #tpu.dot_dimension_numbers<[1], [1], [0], [0], [0, 0, 1, 0], [], []>} : vector<8x4xbf16>, vector<8x4xbf16>, vector<8x8xf32> -> vector<8x8xf32>
    %cst_7 = arith.constant 5.000000e-01 : f32
    %7 = vector.broadcast %cst_7 : f32 to vector<8x8xf32>
    %8 = arith.mulf %6, %7 : vector<8x8xf32>
    %c0_8 = arith.constant 0 : index
    %c0_9 = arith.constant 0 : index
    %c0_10 = arith.constant 0 : index
    %9 = vector.load %arg5[%c0_8, %c0_9, %c0_10] : memref<1x1x8xf32, #tpu.memory_space<vmem>>, vector<1x1x8xf32>
    %10 = vector.shape_cast %9 : vector<1x1x8xf32> to vector<1x8xf32>
    %11 = vector.broadcast %10 : vector<1x8xf32> to vector<8x8xf32>
    %12 = arith.addf %8, %11 : vector<8x8xf32>
    %cst_11 = arith.constant dense<0xFF800000> : vector<8xf32>
    %13 = vector.multi_reduction <maximumf>, %12, %cst_11 [1] : vector<8x8xf32> to vector<8xf32>
    %14 = vector.shape_cast %13 : vector<8xf32> to vector<8x1xf32>
    %15 = vector.broadcast %14 : vector<8x1xf32> to vector<8x8xf32>
    %16 = arith.subf %12, %15 : vector<8x8xf32>
    %17 = math.exp %16 : vector<8x8xf32>
    %cst_12 = arith.constant dense<0.000000e+00> : vector<8xf32>
    %18 = vector.multi_reduction <add>, %17, %cst_12 [1] : vector<8x8xf32> to vector<8xf32>
    %19 = vector.shape_cast %18 : vector<8xf32> to vector<8x1xf32>
    %20 = tpu.reciprocal %19 {approx = true} : vector<8x1xf32> -> vector<8x1xf32>
    %21 = vector.broadcast %20 : vector<8x1xf32> to vector<8x8xf32>
    %22 = arith.mulf %17, %21 : vector<8x8xf32>
    %23 = arith.truncf %22 : vector<8x8xf32> to vector<8x8xbf16>
    %c0_13 = arith.constant 0 : index
    %c0_14 = arith.constant 0 : index
    %c0_15 = arith.constant 0 : index
    %c0_16 = arith.constant 0 : index
    %24 = vector.load %arg4[%c0_13, %c0_14, %c0_15, %c0_16] : memref<1x1x8x4xf32, #tpu.memory_space<vmem>>, vector<1x1x8x4xf32>
    %25 = vector.shape_cast %24 : vector<1x1x8x4xf32> to vector<8x4xf32>
    %26 = arith.truncf %25 : vector<8x4xf32> to vector<8x4xbf16>
    %cst_17 = arith.constant dense<0.000000e+00> : vector<8x4xf32>
    %27 = tpu.matmul %23, %26, %cst_17 {dimension_numbers = #tpu.dot_dimension_numbers<[1], [0], [0], [1], [0, 0, 1, 1], [], []>} : vector<8x8xbf16>, vector<8x4xbf16>, vector<8x4xf32> -> vector<8x4xf32>
    %c0_18 = arith.constant 0 : index
    %c0_19 = arith.constant 0 : index
    %c0_20 = arith.constant 0 : index
    %c0_21 = arith.constant 0 : index
    %28 = vector.load %arg6[%c0_18, %c0_19, %c0_20, %c0_21] : memref<1x1x8x4xf32, #tpu.memory_space<vmem>>, vector<1x1x8x4xf32>
    %29 = vector.shape_cast %28 : vector<1x1x8x4xf32> to vector<8x4xf32>
    %30 = vector.shape_cast %27 : vector<8x4xf32> to vector<1x1x8x4xf32>
    tpu.vector_store %arg6[%c0_18, %c0_19, %c0_20, %c0_21], %30 {strides = array<i32>} : memref<1x1x8x4xf32, #tpu.memory_space<vmem>>, vector<1x1x8x4xf32>,
    return
  }
  func.func @transform_0(%arg0: i32, %arg1: i32) -> (i32, i32, i32, i32) {
    %c0_i32 = arith.constant 0 : i32
    %c0_i32_0 = arith.constant 0 : i32
    %c0_i32_1 = arith.constant 0 : i32
    return %arg0, %arg1, %c0_i32, %c0_i32_0 : i32, i32, i32, i32
  }
  func.func @transform_1(%arg0: i32, %arg1: i32) -> (i32, i32, i32, i32) {
    %c0_i32 = arith.constant 0 : i32
    %c0_i32_0 = arith.constant 0 : i32
    %c0_i32_1 = arith.constant 0 : i32
    return %arg0, %arg1, %c0_i32, %c0_i32_0 : i32, i32, i32, i32
  }
  func.func @transform_2(%arg0: i32, %arg1: i32) -> (i32, i32, i32, i32) {
    %c0_i32 = arith.constant 0 : i32
    %c0_i32_0 = arith.constant 0 : i32
    %c0_i32_1 = arith.constant 0 : i32
    return %arg0, %arg1, %c0_i32, %c0_i32_0 : i32, i32, i32, i32
  }
  func.func @transform_3(%arg0: i32, %arg1: i32) -> (i32, i32, i32) {
    %c0_i32 = arith.constant 0 : i32
    %c0_i32_0 = arith.constant 0 : i32
    %c0_i32_1 = arith.constant 0 : i32
    return %arg0, %c0_i32, %c0_i32_0 : i32, i32, i32
  }
  func.func @transform_4(%arg0: i32, %arg1: i32) -> (i32, i32, i32, i32) {
    %c0_i32 = arith.constant 0 : i32
    %c0_i32_0 = arith.constant 0 : i32
    %c0_i32_1 = arith.constant 0 : i32
    return %arg0, %arg1, %c0_i32, %c0_i32_0 : i32, i32, i32, i32
  }
}

module attributes {stable_mosaic.version = 11 : i64} {
  func.func @_resid_linear_ln_kernel(%arg0: i32, %arg1: memref<16x32xf32, #tpu.memory_space<vmem>>, %arg2: memref<16x32xf32, #tpu.memory_space<vmem>>, %arg3: memref<32x32xf32, #tpu.memory_space<vmem>>, %arg4: memref<3x32xf32, #tpu.memory_space<vmem>>, %arg5: memref<16x32xf32, #tpu.memory_space<vmem>>) attributes {dimension_semantics = [#tpu.dimension_semantics<parallel>], iteration_bounds = array<i64: 1>, scalar_prefetch = 0 : i64, scratch_operands = 0 : i64, tpu.core_type = #tpu.core_type<tc>, window_params = [{transform_indices = @transform_0, window_bounds = array<i64: 16, 32>}, {transform_indices = @transform_1, window_bounds = array<i64: 16, 32>}, {pipeline_mode = #tpu.pipeline_mode<synchronous>, transform_indices = @transform_2, window_bounds = array<i64: 32, 32>}, {pipeline_mode = #tpu.pipeline_mode<synchronous>, transform_indices = @transform_3, window_bounds = array<i64: 3, 32>}, {transform_indices = @transform_4, window_bounds = array<i64: 16, 32>}]} {
    %c0 = arith.constant 0 : index
    %c0_0 = arith.constant 0 : index
    %0 = vector.load %arg1[%c0, %c0_0] : memref<16x32xf32, #tpu.memory_space<vmem>>, vector<16x32xf32>
    %1 = arith.truncf %0 : vector<16x32xf32> to vector<16x32xbf16>
    %c0_1 = arith.constant 0 : index
    %c0_2 = arith.constant 0 : index
    %2 = vector.load %arg3[%c0_1, %c0_2] : memref<32x32xf32, #tpu.memory_space<vmem>>, vector<32x32xf32>
    %3 = arith.truncf %2 : vector<32x32xf32> to vector<32x32xbf16>
    %cst = arith.constant dense<0.000000e+00> : vector<16x32xf32>
    %4 = tpu.matmul %1, %3, %cst {dimension_numbers = #tpu.dot_dimension_numbers<[1], [0], [0], [1], [0, 0, 1, 1], [], []>} : vector<16x32xbf16>, vector<32x32xbf16>, vector<16x32xf32> -> vector<16x32xf32>
    %c0_3 = arith.constant 0 : index
    %c0_4 = arith.constant 0 : index
    %5 = vector.load %arg4[%c0_3, %c0_4] : memref<3x32xf32, #tpu.memory_space<vmem>>, vector<1x32xf32>
    %6 = vector.broadcast %5 : vector<1x32xf32> to vector<16x32xf32>
    %7 = arith.addf %4, %6 : vector<16x32xf32>
    %c0_5 = arith.constant 0 : index
    %c0_6 = arith.constant 0 : index
    %8 = vector.load %arg2[%c0_5, %c0_6] : memref<16x32xf32, #tpu.memory_space<vmem>>, vector<16x32xf32>
    %9 = arith.addf %7, %8 : vector<16x32xf32>
    %cst_7 = arith.constant dense<0.000000e+00> : vector<16xf32>
    %10 = vector.multi_reduction <add>, %9, %cst_7 [1] : vector<16x32xf32> to vector<16xf32>
    %11 = vector.shape_cast %10 : vector<16xf32> to vector<16x1xf32>
    %cst_8 = arith.constant 3.200000e+01 : f32
    %12 = vector.broadcast %cst_8 : f32 to vector<16x1xf32>
    %13 = arith.divf %11, %12 : vector<16x1xf32>
    %14 = vector.broadcast %13 : vector<16x1xf32> to vector<16x32xf32>
    %15 = arith.subf %9, %14 : vector<16x32xf32>
    %16 = arith.mulf %15, %15 : vector<16x32xf32>
    %cst_9 = arith.constant dense<0.000000e+00> : vector<16xf32>
    %17 = vector.multi_reduction <add>, %16, %cst_9 [1] : vector<16x32xf32> to vector<16xf32>
    %18 = vector.shape_cast %17 : vector<16xf32> to vector<16x1xf32>
    %cst_10 = arith.constant 3.200000e+01 : f32
    %19 = vector.broadcast %cst_10 : f32 to vector<16x1xf32>
    %20 = arith.divf %18, %19 : vector<16x1xf32>
    %21 = vector.broadcast %13 : vector<16x1xf32> to vector<16x32xf32>
    %22 = arith.subf %9, %21 : vector<16x32xf32>
    %cst_11 = arith.constant 9.99999974E-6 : f32
    %23 = vector.broadcast %cst_11 : f32 to vector<16x1xf32>
    %24 = arith.addf %20, %23 : vector<16x1xf32>
    %25 = math.rsqrt %24 : vector<16x1xf32>
    %26 = vector.broadcast %25 : vector<16x1xf32> to vector<16x32xf32>
    %27 = arith.mulf %22, %26 : vector<16x32xf32>
    %c1 = arith.constant 1 : index
    %c0_12 = arith.constant 0 : index
    %28 = vector.load %arg4[%c1, %c0_12] : memref<3x32xf32, #tpu.memory_space<vmem>>, vector<1x32xf32>
    %29 = vector.broadcast %28 : vector<1x32xf32> to vector<16x32xf32>
    %30 = arith.mulf %27, %29 : vector<16x32xf32>
    %c2 = arith.constant 2 : index
    %c0_13 = arith.constant 0 : index
    %31 = vector.load %arg4[%c2, %c0_13] : memref<3x32xf32, #tpu.memory_space<vmem>>, vector<1x32xf32>
    %32 = vector.broadcast %31 : vector<1x32xf32> to vector<16x32xf32>
    %33 = arith.addf %30, %32 : vector<16x32xf32>
    %c0_14 = arith.constant 0 : index
    %c0_15 = arith.constant 0 : index
    %34 = vector.load %arg5[%c0_14, %c0_15] : memref<16x32xf32, #tpu.memory_space<vmem>>, vector<16x32xf32>
    tpu.vector_store %arg5[%c0_14, %c0_15], %33 {strides = array<i32>} : memref<16x32xf32, #tpu.memory_space<vmem>>, vector<16x32xf32>,
    return
  }
  func.func @transform_0(%arg0: i32) -> (i32, i32) {
    %c0_i32 = arith.constant 0 : i32
    %c0_i32_0 = arith.constant 0 : i32
    return %arg0, %c0_i32 : i32, i32
  }
  func.func @transform_1(%arg0: i32) -> (i32, i32) {
    %c0_i32 = arith.constant 0 : i32
    %c0_i32_0 = arith.constant 0 : i32
    return %arg0, %c0_i32 : i32, i32
  }
  func.func @transform_2(%arg0: i32) -> (i32, i32) {
    %c0_i32 = arith.constant 0 : i32
    %c0_i32_0 = arith.constant 0 : i32
    %c0_i32_1 = arith.constant 0 : i32
    return %c0_i32, %c0_i32_0 : i32, i32
  }
  func.func @transform_3(%arg0: i32) -> (i32, i32) {
    %c0_i32 = arith.constant 0 : i32
    %c0_i32_0 = arith.constant 0 : i32
    %c0_i32_1 = arith.constant 0 : i32
    return %c0_i32, %c0_i32_0 : i32, i32
  }
  func.func @transform_4(%arg0: i32) -> (i32, i32) {
    %c0_i32 = arith.constant 0 : i32
    %c0_i32_0 = arith.constant 0 : i32
    return %arg0, %c0_i32 : i32, i32
  }
}

module attributes {stable_mosaic.version = 11 : i64} {
  func.func @_linear_kernel(%arg0: i32, %arg1: memref<16x32xf32, #tpu.memory_space<vmem>>, %arg2: memref<32x96xf32, #tpu.memory_space<vmem>>, %arg3: memref<1x96xf32, #tpu.memory_space<vmem>>, %arg4: memref<16x96xf32, #tpu.memory_space<vmem>>) attributes {dimension_semantics = [#tpu.dimension_semantics<parallel>], iteration_bounds = array<i64: 1>, scalar_prefetch = 0 : i64, scratch_operands = 0 : i64, tpu.core_type = #tpu.core_type<tc>, window_params = [{transform_indices = @transform_0, window_bounds = array<i64: 16, 32>}, {pipeline_mode = #tpu.pipeline_mode<synchronous>, transform_indices = @transform_1, window_bounds = array<i64: 32, 96>}, {pipeline_mode = #tpu.pipeline_mode<synchronous>, transform_indices = @transform_2, window_bounds = array<i64: 1, 96>}, {transform_indices = @transform_3, window_bounds = array<i64: 16, 96>}]} {
    %c0 = arith.constant 0 : index
    %c0_0 = arith.constant 0 : index
    %0 = vector.load %arg1[%c0, %c0_0] : memref<16x32xf32, #tpu.memory_space<vmem>>, vector<16x32xf32>
    %1 = arith.truncf %0 : vector<16x32xf32> to vector<16x32xbf16>
    %c0_1 = arith.constant 0 : index
    %c0_2 = arith.constant 0 : index
    %2 = vector.load %arg2[%c0_1, %c0_2] : memref<32x96xf32, #tpu.memory_space<vmem>>, vector<32x96xf32>
    %3 = arith.truncf %2 : vector<32x96xf32> to vector<32x96xbf16>
    %cst = arith.constant dense<0.000000e+00> : vector<16x96xf32>
    %4 = tpu.matmul %1, %3, %cst {dimension_numbers = #tpu.dot_dimension_numbers<[1], [0], [0], [1], [0, 0, 1, 1], [], []>} : vector<16x32xbf16>, vector<32x96xbf16>, vector<16x96xf32> -> vector<16x96xf32>
    %c0_3 = arith.constant 0 : index
    %c0_4 = arith.constant 0 : index
    %5 = vector.load %arg3[%c0_3, %c0_4] : memref<1x96xf32, #tpu.memory_space<vmem>>, vector<1x96xf32>
    %6 = vector.broadcast %5 : vector<1x96xf32> to vector<16x96xf32>
    %7 = arith.addf %4, %6 : vector<16x96xf32>
    %c0_5 = arith.constant 0 : index
    %c0_6 = arith.constant 0 : index
    %8 = vector.load %arg4[%c0_5, %c0_6] : memref<16x96xf32, #tpu.memory_space<vmem>>, vector<16x96xf32>
    tpu.vector_store %arg4[%c0_5, %c0_6], %7 {strides = array<i32>} : memref<16x96xf32, #tpu.memory_space<vmem>>, vector<16x96xf32>,
    return
  }
  func.func @transform_0(%arg0: i32) -> (i32, i32) {
    %c0_i32 = arith.constant 0 : i32
    %c0_i32_0 = arith.constant 0 : i32
    return %arg0, %c0_i32 : i32, i32
  }
  func.func @transform_1(%arg0: i32) -> (i32, i32) {
    %c0_i32 = arith.constant 0 : i32
    %c0_i32_0 = arith.constant 0 : i32
    %c0_i32_1 = arith.constant 0 : i32
    return %c0_i32, %c0_i32_0 : i32, i32
  }
  func.func @transform_2(%arg0: i32) -> (i32, i32) {
    %c0_i32 = arith.constant 0 : i32
    %c0_i32_0 = arith.constant 0 : i32
    %c0_i32_1 = arith.constant 0 : i32
    return %c0_i32, %c0_i32_0 : i32, i32
  }
  func.func @transform_3(%arg0: i32) -> (i32, i32) {
    %c0_i32 = arith.constant 0 : i32
    %c0_i32_0 = arith.constant 0 : i32
    return %arg0, %c0_i32 : i32, i32
  }
}

module attributes {stable_mosaic.version = 11 : i64} {
  func.func @_ffn_ln_kernel(%arg0: i32, %arg1: memref<16x32xf32, #tpu.memory_space<vmem>>, %arg2: memref<32x64xf32, #tpu.memory_space<vmem>>, %arg3: memref<1x64xf32, #tpu.memory_space<vmem>>, %arg4: memref<64x32xf32, #tpu.memory_space<vmem>>, %arg5: memref<3x32xf32, #tpu.memory_space<vmem>>, %arg6: memref<16x32xf32, #tpu.memory_space<vmem>>) attributes {dimension_semantics = [#tpu.dimension_semantics<parallel>], iteration_bounds = array<i64: 1>, scalar_prefetch = 0 : i64, scratch_operands = 0 : i64, tpu.core_type = #tpu.core_type<tc>, window_params = [{transform_indices = @transform_0, window_bounds = array<i64: 16, 32>}, {pipeline_mode = #tpu.pipeline_mode<synchronous>, transform_indices = @transform_1, window_bounds = array<i64: 32, 64>}, {pipeline_mode = #tpu.pipeline_mode<synchronous>, transform_indices = @transform_2, window_bounds = array<i64: 1, 64>}, {pipeline_mode = #tpu.pipeline_mode<synchronous>, transform_indices = @transform_3, window_bounds = array<i64: 64, 32>}, {pipeline_mode = #tpu.pipeline_mode<synchronous>, transform_indices = @transform_4, window_bounds = array<i64: 3, 32>}, {transform_indices = @transform_5, window_bounds = array<i64: 16, 32>}]} {
    %c0 = arith.constant 0 : index
    %c0_0 = arith.constant 0 : index
    %0 = vector.load %arg1[%c0, %c0_0] : memref<16x32xf32, #tpu.memory_space<vmem>>, vector<16x32xf32>
    %1 = arith.truncf %0 : vector<16x32xf32> to vector<16x32xbf16>
    %c0_1 = arith.constant 0 : index
    %c0_2 = arith.constant 0 : index
    %2 = vector.load %arg2[%c0_1, %c0_2] : memref<32x64xf32, #tpu.memory_space<vmem>>, vector<32x64xf32>
    %3 = arith.truncf %2 : vector<32x64xf32> to vector<32x64xbf16>
    %cst = arith.constant dense<0.000000e+00> : vector<16x64xf32>
    %4 = tpu.matmul %1, %3, %cst {dimension_numbers = #tpu.dot_dimension_numbers<[1], [0], [0], [1], [0, 0, 1, 1], [], []>} : vector<16x32xbf16>, vector<32x64xbf16>, vector<16x64xf32> -> vector<16x64xf32>
    %c0_3 = arith.constant 0 : index
    %c0_4 = arith.constant 0 : index
    %5 = vector.load %arg3[%c0_3, %c0_4] : memref<1x64xf32, #tpu.memory_space<vmem>>, vector<1x64xf32>
    %6 = vector.broadcast %5 : vector<1x64xf32> to vector<16x64xf32>
    %7 = arith.addf %4, %6 : vector<16x64xf32>
    %cst_5 = arith.constant 0.000000e+00 : f32
    %8 = vector.broadcast %cst_5 : f32 to vector<16x64xf32>
    %9 = arith.maximumf %7, %8 : vector<16x64xf32>
    %10 = arith.truncf %9 : vector<16x64xf32> to vector<16x64xbf16>
    %c0_6 = arith.constant 0 : index
    %c0_7 = arith.constant 0 : index
    %11 = vector.load %arg4[%c0_6, %c0_7] : memref<64x32xf32, #tpu.memory_space<vmem>>, vector<64x32xf32>
    %12 = arith.truncf %11 : vector<64x32xf32> to vector<64x32xbf16>
    %cst_8 = arith.constant dense<0.000000e+00> : vector<16x32xf32>
    %13 = tpu.matmul %10, %12, %cst_8 {dimension_numbers = #tpu.dot_dimension_numbers<[1], [0], [0], [1], [0, 0, 1, 1], [], []>} : vector<16x64xbf16>, vector<64x32xbf16>, vector<16x32xf32> -> vector<16x32xf32>
    %c0_9 = arith.constant 0 : index
    %c0_10 = arith.constant 0 : index
    %14 = vector.load %arg5[%c0_9, %c0_10] : memref<3x32xf32, #tpu.memory_space<vmem>>, vector<1x32xf32>
    %15 = vector.broadcast %14 : vector<1x32xf32> to vector<16x32xf32>
    %16 = arith.addf %13, %15 : vector<16x32xf32>
    %17 = arith.addf %16, %0 : vector<16x32xf32>
    %cst_11 = arith.constant dense<0.000000e+00> : vector<16xf32>
    %18 = vector.multi_reduction <add>, %17, %cst_11 [1] : vector<16x32xf32> to vector<16xf32>
    %19 = vector.shape_cast %18 : vector<16xf32> to vector<16x1xf32>
    %cst_12 = arith.constant 3.200000e+01 : f32
    %20 = vector.broadcast %cst_12 : f32 to vector<16x1xf32>
    %21 = arith.divf %19, %20 : vector<16x1xf32>
    %22 = vector.broadcast %21 : vector<16x1xf32> to vector<16x32xf32>
    %23 = arith.subf %17, %22 : vector<16x32xf32>
    %24 = arith.mulf %23, %23 : vector<16x32xf32>
    %cst_13 = arith.constant dense<0.000000e+00> : vector<16xf32>
    %25 = vector.multi_reduction <add>, %24, %cst_13 [1] : vector<16x32xf32> to vector<16xf32>
    %26 = vector.shape_cast %25 : vector<16xf32> to vector<16x1xf32>
    %cst_14 = arith.constant 3.200000e+01 : f32
    %27 = vector.broadcast %cst_14 : f32 to vector<16x1xf32>
    %28 = arith.divf %26, %27 : vector<16x1xf32>
    %29 = vector.broadcast %21 : vector<16x1xf32> to vector<16x32xf32>
    %30 = arith.subf %17, %29 : vector<16x32xf32>
    %cst_15 = arith.constant 9.99999974E-6 : f32
    %31 = vector.broadcast %cst_15 : f32 to vector<16x1xf32>
    %32 = arith.addf %28, %31 : vector<16x1xf32>
    %33 = math.rsqrt %32 : vector<16x1xf32>
    %34 = vector.broadcast %33 : vector<16x1xf32> to vector<16x32xf32>
    %35 = arith.mulf %30, %34 : vector<16x32xf32>
    %c1 = arith.constant 1 : index
    %c0_16 = arith.constant 0 : index
    %36 = vector.load %arg5[%c1, %c0_16] : memref<3x32xf32, #tpu.memory_space<vmem>>, vector<1x32xf32>
    %37 = vector.broadcast %36 : vector<1x32xf32> to vector<16x32xf32>
    %38 = arith.mulf %35, %37 : vector<16x32xf32>
    %c2 = arith.constant 2 : index
    %c0_17 = arith.constant 0 : index
    %39 = vector.load %arg5[%c2, %c0_17] : memref<3x32xf32, #tpu.memory_space<vmem>>, vector<1x32xf32>
    %40 = vector.broadcast %39 : vector<1x32xf32> to vector<16x32xf32>
    %41 = arith.addf %38, %40 : vector<16x32xf32>
    %c0_18 = arith.constant 0 : index
    %c0_19 = arith.constant 0 : index
    %42 = vector.load %arg6[%c0_18, %c0_19] : memref<16x32xf32, #tpu.memory_space<vmem>>, vector<16x32xf32>
    tpu.vector_store %arg6[%c0_18, %c0_19], %41 {strides = array<i32>} : memref<16x32xf32, #tpu.memory_space<vmem>>, vector<16x32xf32>,
    return
  }
  func.func @transform_0(%arg0: i32) -> (i32, i32) {
    %c0_i32 = arith.constant 0 : i32
    %c0_i32_0 = arith.constant 0 : i32
    return %arg0, %c0_i32 : i32, i32
  }
  func.func @transform_1(%arg0: i32) -> (i32, i32) {
    %c0_i32 = arith.constant 0 : i32
    %c0_i32_0 = arith.constant 0 : i32
    %c0_i32_1 = arith.constant 0 : i32
    return %c0_i32, %c0_i32_0 : i32, i32
  }
  func.func @transform_2(%arg0: i32) -> (i32, i32) {
    %c0_i32 = arith.constant 0 : i32
    %c0_i32_0 = arith.constant 0 : i32
    %c0_i32_1 = arith.constant 0 : i32
    return %c0_i32, %c0_i32_0 : i32, i32
  }
  func.func @transform_3(%arg0: i32) -> (i32, i32) {
    %c0_i32 = arith.constant 0 : i32
    %c0_i32_0 = arith.constant 0 : i32
    %c0_i32_1 = arith.constant 0 : i32
    return %c0_i32, %c0_i32_0 : i32, i32
  }
  func.func @transform_4(%arg0: i32) -> (i32, i32) {
    %c0_i32 = arith.constant 0 : i32
    %c0_i32_0 = arith.constant 0 : i32
    %c0_i32_1 = arith.constant 0 : i32
    return %c0_i32, %c0_i32_0 : i32, i32
  }
  func.func @transform_5(%arg0: i32) -> (i32, i32) {
    %c0_i32 = arith.constant 0 : i32
    %c0_i32_0 = arith.constant 0 : i32
    return %arg0, %c0_i32 : i32, i32
  }
}

module attributes {stable_mosaic.version = 11 : i64} {
  func.func @_layernorm_kernel(%arg0: i32, %arg1: memref<16x32xf32, #tpu.memory_space<vmem>>, %arg2: memref<2x32xf32, #tpu.memory_space<vmem>>, %arg3: memref<16x32xf32, #tpu.memory_space<vmem>>) attributes {dimension_semantics = [#tpu.dimension_semantics<parallel>], iteration_bounds = array<i64: 1>, scalar_prefetch = 0 : i64, scratch_operands = 0 : i64, tpu.core_type = #tpu.core_type<tc>, window_params = [{transform_indices = @transform_0, window_bounds = array<i64: 16, 32>}, {pipeline_mode = #tpu.pipeline_mode<synchronous>, transform_indices = @transform_1, window_bounds = array<i64: 2, 32>}, {transform_indices = @transform_2, window_bounds = array<i64: 16, 32>}]} {
    %c0 = arith.constant 0 : index
    %c0_0 = arith.constant 0 : index
    %0 = vector.load %arg1[%c0, %c0_0] : memref<16x32xf32, #tpu.memory_space<vmem>>, vector<16x32xf32>
    %cst = arith.constant dense<0.000000e+00> : vector<16xf32>
    %1 = vector.multi_reduction <add>, %0, %cst [1] : vector<16x32xf32> to vector<16xf32>
    %2 = vector.shape_cast %1 : vector<16xf32> to vector<16x1xf32>
    %cst_1 = arith.constant 3.200000e+01 : f32
    %3 = vector.broadcast %cst_1 : f32 to vector<16x1xf32>
    %4 = arith.divf %2, %3 : vector<16x1xf32>
    %5 = vector.broadcast %4 : vector<16x1xf32> to vector<16x32xf32>
    %6 = arith.subf %0, %5 : vector<16x32xf32>
    %7 = arith.mulf %6, %6 : vector<16x32xf32>
    %cst_2 = arith.constant dense<0.000000e+00> : vector<16xf32>
    %8 = vector.multi_reduction <add>, %7, %cst_2 [1] : vector<16x32xf32> to vector<16xf32>
    %9 = vector.shape_cast %8 : vector<16xf32> to vector<16x1xf32>
    %cst_3 = arith.constant 3.200000e+01 : f32
    %10 = vector.broadcast %cst_3 : f32 to vector<16x1xf32>
    %11 = arith.divf %9, %10 : vector<16x1xf32>
    %12 = vector.broadcast %4 : vector<16x1xf32> to vector<16x32xf32>
    %13 = arith.subf %0, %12 : vector<16x32xf32>
    %cst_4 = arith.constant 9.99999974E-6 : f32
    %14 = vector.broadcast %cst_4 : f32 to vector<16x1xf32>
    %15 = arith.addf %11, %14 : vector<16x1xf32>
    %16 = math.rsqrt %15 : vector<16x1xf32>
    %17 = vector.broadcast %16 : vector<16x1xf32> to vector<16x32xf32>
    %18 = arith.mulf %13, %17 : vector<16x32xf32>
    %c0_5 = arith.constant 0 : index
    %c0_6 = arith.constant 0 : index
    %19 = vector.load %arg2[%c0_5, %c0_6] : memref<2x32xf32, #tpu.memory_space<vmem>>, vector<1x32xf32>
    %20 = vector.broadcast %19 : vector<1x32xf32> to vector<16x32xf32>
    %21 = arith.mulf %18, %20 : vector<16x32xf32>
    %c1 = arith.constant 1 : index
    %c0_7 = arith.constant 0 : index
    %22 = vector.load %arg2[%c1, %c0_7] : memref<2x32xf32, #tpu.memory_space<vmem>>, vector<1x32xf32>
    %23 = vector.broadcast %22 : vector<1x32xf32> to vector<16x32xf32>
    %24 = arith.addf %21, %23 : vector<16x32xf32>
    %c0_8 = arith.constant 0 : index
    %c0_9 = arith.constant 0 : index
    %25 = vector.load %arg3[%c0_8, %c0_9] : memref<16x32xf32, #tpu.memory_space<vmem>>, vector<16x32xf32>
    tpu.vector_store %arg3[%c0_8, %c0_9], %24 {strides = array<i32>} : memref<16x32xf32, #tpu.memory_space<vmem>>, vector<16x32xf32>,
    return
  }
  func.func @transform_0(%arg0: i32) -> (i32, i32) {
    %c0_i32 = arith.constant 0 : i32
    %c0_i32_0 = arith.constant 0 : i32
    return %arg0, %c0_i32 : i32, i32
  }
  func.func @transform_1(%arg0: i32) -> (i32, i32) {
    %c0_i32 = arith.constant 0 : i32
    %c0_i32_0 = arith.constant 0 : i32
    %c0_i32_1 = arith.constant 0 : i32
    return %c0_i32, %c0_i32_0 : i32, i32
  }
  func.func @transform_2(%arg0: i32) -> (i32, i32) {
    %c0_i32 = arith.constant 0 : i32
    %c0_i32_0 = arith.constant 0 : i32
    return %arg0, %c0_i32 : i32, i32
  }
}

module attributes {stable_mosaic.version = 11 : i64} {
  func.func @_linear_kernel(%arg0: i32, %arg1: memref<16x32xf32, #tpu.memory_space<vmem>>, %arg2: memref<32x64xf32, #tpu.memory_space<vmem>>, %arg3: memref<1x64xf32, #tpu.memory_space<vmem>>, %arg4: memref<16x64xf32, #tpu.memory_space<vmem>>) attributes {dimension_semantics = [#tpu.dimension_semantics<parallel>], iteration_bounds = array<i64: 1>, scalar_prefetch = 0 : i64, scratch_operands = 0 : i64, tpu.core_type = #tpu.core_type<tc>, window_params = [{transform_indices = @transform_0, window_bounds = array<i64: 16, 32>}, {pipeline_mode = #tpu.pipeline_mode<synchronous>, transform_indices = @transform_1, window_bounds = array<i64: 32, 64>}, {pipeline_mode = #tpu.pipeline_mode<synchronous>, transform_indices = @transform_2, window_bounds = array<i64: 1, 64>}, {transform_indices = @transform_3, window_bounds = array<i64: 16, 64>}]} {
    %c0 = arith.constant 0 : index
    %c0_0 = arith.constant 0 : index
    %0 = vector.load %arg1[%c0, %c0_0] : memref<16x32xf32, #tpu.memory_space<vmem>>, vector<16x32xf32>
    %1 = arith.truncf %0 : vector<16x32xf32> to vector<16x32xbf16>
    %c0_1 = arith.constant 0 : index
    %c0_2 = arith.constant 0 : index
    %2 = vector.load %arg2[%c0_1, %c0_2] : memref<32x64xf32, #tpu.memory_space<vmem>>, vector<32x64xf32>
    %3 = arith.truncf %2 : vector<32x64xf32> to vector<32x64xbf16>
    %cst = arith.constant dense<0.000000e+00> : vector<16x64xf32>
    %4 = tpu.matmul %1, %3, %cst {dimension_numbers = #tpu.dot_dimension_numbers<[1], [0], [0], [1], [0, 0, 1, 1], [], []>} : vector<16x32xbf16>, vector<32x64xbf16>, vector<16x64xf32> -> vector<16x64xf32>
    %c0_3 = arith.constant 0 : index
    %c0_4 = arith.constant 0 : index
    %5 = vector.load %arg3[%c0_3, %c0_4] : memref<1x64xf32, #tpu.memory_space<vmem>>, vector<1x64xf32>
    %6 = vector.broadcast %5 : vector<1x64xf32> to vector<16x64xf32>
    %7 = arith.addf %4, %6 : vector<16x64xf32>
    %c0_5 = arith.constant 0 : index
    %c0_6 = arith.constant 0 : index
    %8 = vector.load %arg4[%c0_5, %c0_6] : memref<16x64xf32, #tpu.memory_space<vmem>>, vector<16x64xf32>
    tpu.vector_store %arg4[%c0_5, %c0_6], %7 {strides = array<i32>} : memref<16x64xf32, #tpu.memory_space<vmem>>, vector<16x64xf32>,
    return
  }
  func.func @transform_0(%arg0: i32) -> (i32, i32) {
    %c0_i32 = arith.constant 0 : i32
    %c0_i32_0 = arith.constant 0 : i32
    return %arg0, %c0_i32 : i32, i32
  }
  func.func @transform_1(%arg0: i32) -> (i32, i32) {
    %c0_i32 = arith.constant 0 : i32
    %c0_i32_0 = arith.constant 0 : i32
    %c0_i32_1 = arith.constant 0 : i32
    return %c0_i32, %c0_i32_0 : i32, i32
  }
  func.func @transform_2(%arg0: i32) -> (i32, i32) {
    %c0_i32 = arith.constant 0 : i32
    %c0_i32_0 = arith.constant 0 : i32
    %c0_i32_1 = arith.constant 0 : i32
    return %c0_i32, %c0_i32_0 : i32, i32
  }
  func.func @transform_3(%arg0: i32) -> (i32, i32) {
    %c0_i32 = arith.constant 0 : i32
    %c0_i32_0 = arith.constant 0 : i32
    return %arg0, %c0_i32 : i32, i32
  }
}

module attributes {stable_mosaic.version = 11 : i64} {
  func.func @_layernorm_kernel(%arg0: i32, %arg1: memref<16x32xf32, #tpu.memory_space<vmem>>, %arg2: memref<2x32xf32, #tpu.memory_space<vmem>>, %arg3: memref<16x32xf32, #tpu.memory_space<vmem>>) attributes {dimension_semantics = [#tpu.dimension_semantics<parallel>], iteration_bounds = array<i64: 1>, scalar_prefetch = 0 : i64, scratch_operands = 0 : i64, tpu.core_type = #tpu.core_type<tc>, window_params = [{transform_indices = @transform_0, window_bounds = array<i64: 16, 32>}, {pipeline_mode = #tpu.pipeline_mode<synchronous>, transform_indices = @transform_1, window_bounds = array<i64: 2, 32>}, {transform_indices = @transform_2, window_bounds = array<i64: 16, 32>}]} {
    %c0 = arith.constant 0 : index
    %c0_0 = arith.constant 0 : index
    %0 = vector.load %arg1[%c0, %c0_0] : memref<16x32xf32, #tpu.memory_space<vmem>>, vector<16x32xf32>
    %cst = arith.constant dense<0.000000e+00> : vector<16xf32>
    %1 = vector.multi_reduction <add>, %0, %cst [1] : vector<16x32xf32> to vector<16xf32>
    %2 = vector.shape_cast %1 : vector<16xf32> to vector<16x1xf32>
    %cst_1 = arith.constant 3.200000e+01 : f32
    %3 = vector.broadcast %cst_1 : f32 to vector<16x1xf32>
    %4 = arith.divf %2, %3 : vector<16x1xf32>
    %5 = vector.broadcast %4 : vector<16x1xf32> to vector<16x32xf32>
    %6 = arith.subf %0, %5 : vector<16x32xf32>
    %7 = arith.mulf %6, %6 : vector<16x32xf32>
    %cst_2 = arith.constant dense<0.000000e+00> : vector<16xf32>
    %8 = vector.multi_reduction <add>, %7, %cst_2 [1] : vector<16x32xf32> to vector<16xf32>
    %9 = vector.shape_cast %8 : vector<16xf32> to vector<16x1xf32>
    %cst_3 = arith.constant 3.200000e+01 : f32
    %10 = vector.broadcast %cst_3 : f32 to vector<16x1xf32>
    %11 = arith.divf %9, %10 : vector<16x1xf32>
    %12 = vector.broadcast %4 : vector<16x1xf32> to vector<16x32xf32>
    %13 = arith.subf %0, %12 : vector<16x32xf32>
    %cst_4 = arith.constant 9.99999974E-6 : f32
    %14 = vector.broadcast %cst_4 : f32 to vector<16x1xf32>
    %15 = arith.addf %11, %14 : vector<16x1xf32>
    %16 = math.rsqrt %15 : vector<16x1xf32>
    %17 = vector.broadcast %16 : vector<16x1xf32> to vector<16x32xf32>
    %18 = arith.mulf %13, %17 : vector<16x32xf32>
    %c0_5 = arith.constant 0 : index
    %c0_6 = arith.constant 0 : index
    %19 = vector.load %arg2[%c0_5, %c0_6] : memref<2x32xf32, #tpu.memory_space<vmem>>, vector<1x32xf32>
    %20 = vector.broadcast %19 : vector<1x32xf32> to vector<16x32xf32>
    %21 = arith.mulf %18, %20 : vector<16x32xf32>
    %c1 = arith.constant 1 : index
    %c0_7 = arith.constant 0 : index
    %22 = vector.load %arg2[%c1, %c0_7] : memref<2x32xf32, #tpu.memory_space<vmem>>, vector<1x32xf32>
    %23 = vector.broadcast %22 : vector<1x32xf32> to vector<16x32xf32>
    %24 = arith.addf %21, %23 : vector<16x32xf32>
    %c0_8 = arith.constant 0 : index
    %c0_9 = arith.constant 0 : index
    %25 = vector.load %arg3[%c0_8, %c0_9] : memref<16x32xf32, #tpu.memory_space<vmem>>, vector<16x32xf32>
    tpu.vector_store %arg3[%c0_8, %c0_9], %24 {strides = array<i32>} : memref<16x32xf32, #tpu.memory_space<vmem>>, vector<16x32xf32>,
    return
  }
  func.func @transform_0(%arg0: i32) -> (i32, i32) {
    %c0_i32 = arith.constant 0 : i32
    %c0_i32_0 = arith.constant 0 : i32
    return %arg0, %c0_i32 : i32, i32
  }
  func.func @transform_1(%arg0: i32) -> (i32, i32) {
    %c0_i32 = arith.constant 0 : i32
    %c0_i32_0 = arith.constant 0 : i32
    %c0_i32_1 = arith.constant 0 : i32
    return %c0_i32, %c0_i32_0 : i32, i32
  }
  func.func @transform_2(%arg0: i32) -> (i32, i32) {
    %c0_i32 = arith.constant 0 : i32
    %c0_i32_0 = arith.constant 0 : i32
    return %arg0, %c0_i32 : i32, i32
  }
}

</mosaic_0001>

<bundles_post_ra>
// kernel: _lambda_.35
= control target key start
LH: loop header
LB: loop body
LE: loop exit
PB: predicated region body
PF: predicated region fallthrough
CT: control target
= control target key end

     0   :  { %8 = vsyncpa [#allocation3], 0  ;;  %s138_s12 = smov [#allocation2]   ;;  %s187_s0 = inlined_call_operand.hbm [shape: f32[16,32], index: 0, kind: input, shape index: {}]   ;;  %s188_s1 = inlined_call_operand.vmem [shape: f32[32,96], index: 1, kind: input, shape index: {}]   ;;  %s189_s2 = inlined_call_operand.vmem [shape: f32[1,96], index: 2, kind: input, shape index: {}]   ;;  %s190_s3 = inlined_call_operand.vmem [shape: f32[16,96], index: 3, kind: output, shape index: {}]  }
   0x1   :  { %s14_s13 = sshll.u32 %s138_s12, 4  ;;  %s15_s13 = int_to_ptr.vmem [resolvable:$true] %s14_s13 }
   0x2   :  { %s124_s14 = scalar_lea.vmem %s15_s13, 256  ;;  %p129_p1 = scmp.lt.s32.totalorder %s15_s13, %s15_s13 }
   0x3   :  { %p125_p0 = scmp.ne.s32.totalorder %s15_s13, %s124_s14  ;;  %p130_p2 = scmp.lt.s32.totalorder %s124_s14, %s124_s14 }
   0x5   :  { %p131_p3 = por %p130_p2, %p129_p1 }
   0x7   :  { %p132_p4 = pnand %p131_p3, %p125_p0 }
   0x9   :  { %135 = shalt.err (!%p132_p4)
}
   0xa   :  { %s139_s15 = smov 128   ;;  %s140_s16 = smov 8  }
   0xb   :  { %20 = dma.hbm_to_vmem [thread:$0]  %s187_s0, 256, %s15_s13, [#allocation3], %s139_s15, %s139_s15, %s140_s16  }
   0xc   :  { %136 = dma.done.wait [#allocation3], 256  }
   0xd   :  { %137 = vsyncadd [#allocation3], 4294967040  ;;  %v141_v0 = vmov 0.0   ;;  %vm142_vm0 = vmmov 0   ;;  %v34_v1 = vld [vmem:[%s188_s1 + $0x10] sm:$0xff]  ;;  %v35_v2 = vld [vmem:[%s188_s1 + $0x18] sm:$0xff] }
   0xe   :  { %103 = vmatprep.subr.bf16.mxu0 %v141_v0  ;;  %107 = vmatprep.mubr.msk.bf16.mxu0 %vm142_vm0, %v141_v0  ;;  %v32_v3 = vld [vmem:[%s188_s1] sm:$0xff]  ;;  %v37_v4 = vpack.c.bf16 %v35_v2, %v34_v1  ;;  %v33_v5 = vld [vmem:[%s188_s1 + $0x8] sm:$0xff]  ;;  %vm45_vm1 = vcmask 261120   ;;  %vm90_vm2 = vcmask 785408  }
   0xf   :  { %v36_v6 = vpack.c.bf16 %v33_v5, %v32_v3  ;;  %v29_v7 = vld [vmem:[#allocation2] sm:$0xff]  ;;  %v30_v8 = vld [vmem:[#allocation2 + $0x8] sm:$0xff] }
  0x10   :  { %104 = vmatpush3.bf16.msra.mxu0 %v37_v4  ;;  %v31_v9 = vpack.c.bf16 %v30_v8, %v29_v7  ;;  %v98_v10 = vld [vmem:[%s189_s2] ss:$0 sm:$0xff] }
  0x11   :  { %105 = vmatprep.subr.bf16.mxu0 %v141_v0 }
  0x14   :  { %106 = vmatpush3.bf16.msra.mxu0 %v36_v6 }
  0x17   :  { %108 = vmatmul.mubr.msk.bf16.vlgmr.msra.gmra.mxu0 %vm45_vm1, %v31_v9 }
  0xd7   :  { %v83_v11 = vpop.f32.mrf.mxu0 }
  0xd8   :  { %v84_v12 = vadd.f32 %v98_v10, %v83_v11 }
  0xd9   :  { %v109_v13 = vpop.f32.mrf.mxu0 }
  0xda   :  { %91 = vst.msk [vmem:[%s190_s3] sm:$0xff] %vm90_vm2, %v84_v12 }
  0xdb   :  { %v86_v14 = vpop.f32.mrf.mxu0 }
  0xdc   :  { %v87_v15 = vadd.f32 %v98_v10, %v86_v14 }
  0xdd   :  { %v110_v16 = vpop.f32.mrf.mxu0 }
  0xde   :  { %92 = vst.msk [vmem:[%s190_s3 + $0x8] sm:$0xff] %vm90_vm2, %v87_v15 }
  0xdf   :  { %97 = vsyncpa [#allocation3], 1 }

// kernel: _lambda_.38
= control target key start
LH: loop header
LB: loop body
LE: loop exit
PB: predicated region body
PF: predicated region fallthrough
CT: control target
= control target key end

     0   :  { %v97_v0 = vmov 0.0   ;;  %vm98_vm0 = vmmov 0   ;;  %vm31_vm1 = vcmask 261120   ;;  %s146_s1 = inlined_call_operand.vmem [shape: f32[32,32], index: 1, kind: input, shape index: {}]   ;;  %s147_s0 = inlined_call_operand.vmem [shape: f32[16,32], index: 0, kind: input, shape index: {}]   ;;  %s148_s2 = inlined_call_operand.vmem [shape: f32[1,32], index: 2, kind: input, shape index: {}]   ;;  %s149_s3 = inlined_call_operand.vmem [shape: f32[16,32], index: 3, kind: output, shape index: {}]  }
   0x1   :  { %87 = vmatprep.subr.bf16.mxu0 %v97_v0  ;;  %v20_v1 = vld [vmem:[%s146_s1 + $0x10] sm:$0xff]  ;;  %v21_v2 = vld [vmem:[%s146_s1 + $0x18] sm:$0xff]  ;;  %v18_v3 = vld [vmem:[%s146_s1] sm:$0xff]  ;;  %91 = vmatprep.mubr.msk.bf16.mxu0 %vm98_vm0, %v97_v0 }
   0x2   :  { %v23_v4 = vpack.c.bf16 %v21_v2, %v20_v1  ;;  %v19_v5 = vld [vmem:[%s146_s1 + $0x8] sm:$0xff]  ;;  %v15_v7 = vld [vmem:[%s147_s0] sm:$0xff] }
   0x3   :  { %v22_v6 = vpack.c.bf16 %v19_v5, %v18_v3  ;;  %v16_v8 = vld [vmem:[%s147_s0 + $0x8] sm:$0xff]  ;;  %v82_v10 = vld [vmem:[%s148_s2] ss:$0 sm:$0xff] }
   0x4   :  { %88 = vmatpush3.bf16.msra.mxu0 %v23_v4  ;;  %v17_v9 = vpack.c.bf16 %v16_v8, %v15_v7 }
   0x5   :  { %89 = vmatprep.subr.bf16.mxu0 %v97_v0 }
   0x8   :  { %90 = vmatpush3.bf16.msra.mxu0 %v22_v6 }
   0xb   :  { %92 = vmatmul.mubr.msk.bf16.vlgmr.msra.gmra.mxu0 %vm31_vm1, %v17_v9 }
  0xcb   :  { %v69_v11 = vpop.f32.mrf.mxu0 }
  0xcc   :  { %v70_v12 = vadd.f32 %v82_v10, %v69_v11 }
  0xcd   :  { %v93_v13 = vpop.f32.mrf.mxu0 }
  0xce   :  { %76 = vst.msk [vmem:[%s149_s3] sm:$0xff] %vm31_vm1, %v70_v12 }
  0xcf   :  { %v72_v14 = vpop.f32.mrf.mxu0 }
  0xd0   :  { %v73_v15 = vadd.f32 %v82_v10, %v72_v14 }
  0xd1   :  { %v94_v16 = vpop.f32.mrf.mxu0 }
  0xd2   :  { %77 = vst.msk [vmem:[%s149_s3 + $0x8] sm:$0xff] %vm31_vm1, %v73_v15 }

// kernel: _lambda_.37
= control target key start
LH: loop header
LB: loop body
LE: loop exit
PB: predicated region body
PF: predicated region fallthrough
CT: control target
= control target key end

     0   :  { %v149_v0 = vmov 0.0   ;;  %vm150_vm0 = vmmov 0   ;;  %vm32_vm1 = vcmask 261120   ;;  %s222_s2 = inlined_call_operand.vmem [shape: f32[32,32], index: 2, kind: input, shape index: {}]   ;;  %s223_s0 = inlined_call_operand.vmem [shape: f32[16,32], index: 0, kind: input, shape index: {}]   ;;  %s224_s3 = inlined_call_operand.vmem [shape: f32[3,32], index: 3, kind: input, shape index: {}]   ;;  %s225_s1 = inlined_call_operand.vmem [shape: f32[16,32], index: 1, kind: input, shape index: {}]   ;;  %s226_s4 = inlined_call_operand.vmem [shape: f32[16,32], index: 4, kind: output, shape index: {}]  }
   0x1   :  { %135 = vmatprep.subr.bf16.mxu0 %v149_v0  ;;  %v23_v1 = vld [vmem:[%s222_s2 + $0x10] sm:$0xff]  ;;  %v24_v2 = vld [vmem:[%s222_s2 + $0x18] sm:$0xff]  ;;  %v21_v3 = vld [vmem:[%s222_s2] sm:$0xff]  ;;  %139 = vmatprep.mubr.msk.bf16.mxu0 %vm150_vm0, %v149_v0 }
   0x2   :  { %v26_v4 = vpack.c.bf16 %v24_v2, %v23_v1  ;;  %v22_v5 = vld [vmem:[%s222_s2 + $0x8] sm:$0xff]  ;;  %v18_v7 = vld [vmem:[%s223_s0] sm:$0xff] }
   0x3   :  { %v25_v6 = vpack.c.bf16 %v22_v5, %v21_v3  ;;  %v19_v8 = vld [vmem:[%s223_s0 + $0x8] sm:$0xff]  ;;  %v128_v10 = vld [vmem:[%s224_s3] ss:$0 sm:$0xff]  ;;  %v130_v40 = vld [vmem:[%s224_s3 + $0x1] ss:$0 sm:$0xff] }
   0x4   :  { %136 = vmatpush3.bf16.msra.mxu0 %v26_v4  ;;  %v20_v9 = vpack.c.bf16 %v19_v8, %v18_v7  ;;  %v77_v12 = vld [vmem:[%s225_s1] sm:$0xff]  ;;  %v78_v17 = vld [vmem:[%s225_s1 + $0x8] sm:$0xff] }
   0x5   :  { %137 = vmatprep.subr.bf16.mxu0 %v149_v0  ;;  %v131_v42 = vld [vmem:[%s224_s3 + $0x2] ss:$0 sm:$0xff] }
   0x8   :  { %138 = vmatpush3.bf16.msra.mxu0 %v25_v6 }
   0xb   :  { %140 = vmatmul.mubr.msk.bf16.vlgmr.msra.gmra.mxu0 %vm32_vm1, %v20_v9 }
  0xcb   :  { %v70_v11 = vpop.f32.mrf.mxu0 }
  0xcc   :  { %v71_v13 = vadd.f32 %v128_v10, %v70_v11 }
  0xcd   :  { %v141_v14 = vpop.f32.mrf.mxu0 }
  0xce   :  { %v79_v15 = vadd.f32 %v77_v12, %v71_v13 }
  0xcf   :  { %v73_v16 = vpop.f32.mrf.mxu0 }
  0xd0   :  { %v74_v18 = vadd.f32 %v128_v10, %v73_v16  ;;  %v81_v19 = vsel %vm32_vm1, %v79_v15, 0.0 }
  0xd1   :  { %82 = vadd.xlane.f32.xlu0 %v81_v19  ;;  %v142_v20 = vpop.f32.mrf.mxu0 }
  0xd2   :  { %v80_v21 = vadd.f32 %v78_v17, %v74_v18 }
  0xd4   :  { %v84_v22 = vsel %vm32_vm1, %v80_v21, 0.0 }
  0xd5   :  { %85 = vadd.xlane.f32.xlu0 %v84_v22 }
 0x15a   :  { %v83_v23 = vpop.xlane.xlu0 %82 }
 0x15b   :  { %v88_v24 = vmul.f32 0.03125, %v83_v23 }
 0x15d   :  { %v90_v25 = vsub.f32 %v79_v15, %v88_v24 }
 0x15e   :  { %v86_v26 = vpop.xlane.xlu0 %85 }
 0x15f   :  { %v89_v27 = vmul.f32 0.03125, %v86_v26  ;;  %v92_v28 = vmul.f32 %v90_v25, %v90_v25 }
 0x161   :  { %v91_v29 = vsub.f32 %v80_v21, %v89_v27  ;;  %v94_v30 = vsel %vm32_vm1, %v92_v28, 0.0 }
 0x162   :  { %95 = vadd.xlane.f32.xlu1 %v94_v30 }
 0x163   :  { %v93_v31 = vmul.f32 %v91_v29, %v91_v29 }
 0x165   :  { %v97_v32 = vsel %vm32_vm1, %v93_v31, 0.0 }
 0x166   :  { %98 = vadd.xlane.f32.xlu1 %v97_v32 }
 0x1eb   :  { %v96_v33 = vpop.xlane.xlu1 %95 }
 0x1ec   :  { %v100_v34 = vmul.f32 0.03125, %v96_v33 }
 0x1ee   :  { %v102_v35 = vadd.f32 1e-05, %v100_v34 }
 0x1ef   :  { %v99_v36 = vpop.xlane.xlu1 %98 }
 0x1f0   :  { %145 = vrsqrt.f32 %v102_v35  ;;  %v101_v37 = vmul.f32 0.03125, %v99_v36 }
 0x1f2   :  { %v103_v38 = vadd.f32 1e-05, %v101_v37 }
 0x1f4   :  { %147 = vrsqrt.f32 %v103_v38 }
 0x1fd   :  { %v146_v39 = vpop.eup %145 }
 0x1fe   :  { %v106_v41 = vmul.f32 %v146_v39, %v90_v25 }
 0x200   :  { %v113_v43 = vmul.f32 %v130_v40, %v106_v41 }
 0x201   :  { %v148_v44 = vpop.eup %147 }
 0x202   :  { %v120_v45 = vadd.f32 %v131_v42, %v113_v43  ;;  %v107_v46 = vmul.f32 %v148_v44, %v91_v29 }
 0x204   :  { %122 = vst.msk [vmem:[%s226_s4] sm:$0xff] %vm32_vm1, %v120_v45  ;;  %v114_v47 = vmul.f32 %v130_v40, %v107_v46 }
 0x206   :  { %v121_v48 = vadd.f32 %v131_v42, %v114_v47 }
 0x208   :  { %123 = vst.msk [vmem:[%s226_s4 + $0x8] sm:$0xff] %vm32_vm1, %v121_v48 }

// kernel: _lambda_.36
= control target key start
LH: loop header
LB: loop body
LE: loop exit
PB: predicated region body
PF: predicated region fallthrough
CT: control target
= control target key end

     0   :  { %s707_s15 = smov 0   ;;  %s709_s16 = smov 0   ;;  %s779_s0 = inlined_call_operand.vmem [shape: f32[2,8,8,4], index: 0, kind: input, shape index: {}]   ;;  %s780_s1 = inlined_call_operand.vmem [shape: f32[2,8,8,4], index: 1, kind: input, shape index: {}]   ;;  %s781_s2 = inlined_call_operand.vmem [shape: f32[2,8,8,4], index: 2, kind: input, shape index: {}]   ;;  %s782_s3 = inlined_call_operand.vmem [shape: f32[2,1,8], index: 3, kind: input, shape index: {}]   ;;  %s783_s4 = inlined_call_operand.vmem [shape: f32[2,8,8,4], index: 4, kind: output, shape index: {}]  }
   0x1   :  { %s711_s17 = smov 0   ;;  %s713_s18 = smov 0  }
   0x2   :  { %s715_s19 = smov 0  }
   0x3 LB: > { %s23_s20 = sadd.s32 1, %s670_s17  ;;  %s26_s21 = sadd.s32 1, %s674_s18  ;;  %s678_s19 = sphi %s715_s19, %s14_s19   ;;  %s674_s18 = sphi %s713_s18, %s787_s18   ;;  %s670_s17 = sphi %s711_s17, %s786_s17   ;;  %s666_s16 = sphi %s709_s16, %s785_s16   ;;  %s662_s15 = sphi %s707_s15, %s784_s15  }
   0x4   : > { %p24_p0 = scmp.ge.s32.totalorder %s23_s20, 8  ;;  %p564_p1 = scmp.ge.s32.totalorder %s678_s19, 1 }
   0x5   : > { %p219_p2 = scmp.lt.s32.totalorder %s678_s19, 17 }
   0x6   : > { %s789_s20 = smov (%p24_p0, %s23_s20), 0  ;;  %s791_s21 = smov (!%p24_p0, %s26_s21), %s674_s18 }
   0x7   : > { %p220_p3 = pnand %p564_p1, %p219_p2  ;;  %p28_p4 = scmp.ge.s32.totalorder %s791_s21, 2 }
   0x8   : > { %p270_p5 = scmp.lt.s32.totalorder (!%p220_p3), %s666_s16, 1  ;;  %p272_p6 = scmp.lt.s32.totalorder (!%p220_p3), %s662_s15, 7 }
   0x9   : > { %s793_s21 = smov (%p28_p4, %s791_s21), 0  ;;  %223 = sbr.rel (%p220_p3) target bundleno = 740 (0x2e4), region = 36 }
   0xe   : > { %v680_v0 = vmov 0.0   ;;  %vm681_vm0 = vmmov 0   ;;  %s795_s16 = smov (!%p270_p5, %s666_s16), 1  ;;  %s797_s15 = smov (!%p272_p6, %s662_s15), 7  ;;  %vm310_vm1 = vcmask 31744   ;;  %vm366_vm2 = vcmask 64512  }
   0xf   : > { %582 = vmatprep.subr.bf16.mxu0 %v680_v0  ;;  %584 = vmatprep.mubr.msk.bf16.mxu0 %vm681_vm0, %v680_v0  ;;  %s565_s22 = sshll.u32 %s795_s16, 3  ;;  %s296_s7 = scalar_lea.vmem %s782_s3, %s795_s16  ;;  %vm384_vm3 = vcmask 1043456  }
  0x10   : > { %588 = vmatprep.subr.bf16.mxu1 %v680_v0  ;;  %590 = vmatprep.mubr.msk.bf16.mxu1 %vm681_vm0, %v680_v0  ;;  %s275_s23 = sadd.s32 %s565_s22, %s797_s15  ;;  %v574_v7 = vld [vmem:[%s296_s7] ss:$0 sm:$0xff] }
  0x11   : > { %s737_s24 = sshll.u32 %s275_s23, 3 }
  0x12   : > { %s285_s27 = scalar_lea.vmem %s780_s1, %s737_s24  ;;  %s277_s30 = scalar_lea.vmem %s779_s0, %s737_s24 }
  0x13   : > { %v308_v1 = vld [vmem:[%s285_s27] sm:$0xff]  ;;  %s293_s10 = scalar_lea.vmem %s781_s2, %s737_s24  ;;  %s304_s13 = scalar_lea.vmem %s783_s4, %s737_s24 }
  0x14   : > { %v309_v2 = vpack.c.bf16 %v308_v1, %v308_v1  ;;  %v306_v4 = vld [vmem:[%s277_s30] sm:$0xff] }
  0x15   : > { %v307_v5 = vpack.c.bf16 %v306_v4, %v306_v4  ;;  %v379_v19 = vld [vmem:[%s293_s10] sm:$0xff] }
  0x16   : > { %v315_v3 = vsel %vm310_vm1, %v309_v2, 0  ;;  %v380_v20 = vpack.c.bf16 %v379_v19, %v379_v19 }
  0x17   : > { %583 = vmatpush3.bf16.xpose.msra.mxu0 %v315_v3 }
  0x18   : > { %v386_v21 = vsel %vm384_vm3, %v380_v20, 0 }
  0x19   : > { %589 = vmatpush3.bf16.msra.mxu1 %v386_v21 }
  0x1e   : > { %585 = vmatmul.mubr.msk.bf16.vlgmr.msra.gmra.mxu0 %vm310_vm1, %v307_v5 }
  0xde   : > { %v351_v6 = vpop.f32.mrf.mxu0 }
  0xdf   : > { %v357_v8 = vmul.f32 0.5, %v351_v6 }
  0xe0   : > { %v586_v9 = vpop.f32.mrf.mxu0 }
  0xe1   : > { %v365_v10 = vadd.f32 %v574_v7, %v357_v8 }
  0xe2   : > { %v354_v11 = vpop.f32.mrf.mxu0 }
  0xe3   : > { %v367_v12 = vsel %vm366_vm2, %v365_v10, -inf }
  0xe4   : > { %368 = vmax.xlane.f32.xlu0 %v367_v12  ;;  %v587_v13 = vpop.f32.mrf.mxu0 }
 0x16d   : > { %v369_v14 = vpop.xlane.xlu0 %368 }
 0x16e   : > { %v370_v15 = vsub.f32 %v365_v10, %v369_v14 }
 0x170   : > { %v371_v16 = vmul.f32 1.442695, %v370_v15 }
 0x172   : > { %636 = vpow2.f32 %v371_v16 }
 0x17f   : > { %v637_v17 = vpop.eup %636 }
 0x180   : > { %v373_v18 = vsel %vm366_vm2, %v637_v17, 0.0 }
 0x181   : > { %374 = vadd.xlane.f32.xlu0 %v373_v18 }
 0x20a   : > { %v375_v22 = vpop.xlane.xlu0 %374 }
 0x20b   : > { %638 = vrcp.f32 %v375_v22 }
 0x218   : > { %v639_v23 = vpop.eup %638 }
 0x219   : > { %v377_v24 = vmul.f32 %v639_v23, %v637_v17 }
 0x21b   : > { %v378_v25 = vpack.c.bf16 %v377_v24, %v377_v24 }
 0x21d   : > { %591 = vmatmul.mubr.msk.bf16.vlgmr.msra.gmra.mxu1 %vm366_vm2, %v378_v25 }
 0x2dd   : > { %v422_v26 = vpop.f32.mrf.mxu1 }
 0x2de   : > { %428 = vst.msk [vmem:[%s304_s13] sm:$0xff] %vm310_vm1, %v422_v26 }
 0x2df   : > { %v592_v27 = vpop.f32.mrf.mxu1 }
 0x2e1   : > { %v425_v28 = vpop.f32.mrf.mxu1 }
 0x2e3   : > { %v593_v29 = vpop.f32.mrf.mxu1 }
 0x2e4 PF: > { %s14_s19 = sadd.s32 1, %s678_s19   ;;  %s784_s15 = smov %s670_s17 }
 0x2e5   : > { %p11_p7 = scmp.ge.s32.totalorder %s14_s19, 18   ;;  %s785_s16 = smov %s674_s18 }
 0x2e6   : > { %s786_s17 = smov %s789_s20  ;;  %s787_s18 = smov %s793_s21 }
 0x2e7   :  { %13 = sbr.rel (!%p11_p7) target bundleno = 3 (0x3), region = 75 }

// kernel: _lambda_.26
= control target key start
LH: loop header
LB: loop body
LE: loop exit
PB: predicated region body
PF: predicated region fallthrough
CT: control target
= control target key end

     0   :  { %v98_v0 = vmov 0.0   ;;  %vm99_vm0 = vmmov 0   ;;  %vm31_vm1 = vcmask 261120   ;;  %vm76_vm2 = vcmask 785408   ;;  %s147_s1 = inlined_call_operand.vmem [shape: f32[32,96], index: 1, kind: input, shape index: {}]   ;;  %s148_s0 = inlined_call_operand.vmem [shape: f32[16,32], index: 0, kind: input, shape index: {}]   ;;  %s149_s2 = inlined_call_operand.vmem [shape: f32[1,96], index: 2, kind: input, shape index: {}]   ;;  %s150_s3 = inlined_call_operand.vmem [shape: f32[16,96], index: 3, kind: output, shape index: {}]  }
   0x1   :  { %88 = vmatprep.subr.bf16.mxu0 %v98_v0  ;;  %v20_v1 = vld [vmem:[%s147_s1 + $0x10] sm:$0xff]  ;;  %v21_v2 = vld [vmem:[%s147_s1 + $0x18] sm:$0xff]  ;;  %v18_v3 = vld [vmem:[%s147_s1] sm:$0xff]  ;;  %92 = vmatprep.mubr.msk.bf16.mxu0 %vm99_vm0, %v98_v0 }
   0x2   :  { %v23_v4 = vpack.c.bf16 %v21_v2, %v20_v1  ;;  %v19_v5 = vld [vmem:[%s147_s1 + $0x8] sm:$0xff]  ;;  %v15_v7 = vld [vmem:[%s148_s0] sm:$0xff] }
   0x3   :  { %v22_v6 = vpack.c.bf16 %v19_v5, %v18_v3  ;;  %v16_v8 = vld [vmem:[%s148_s0 + $0x8] sm:$0xff]  ;;  %v83_v10 = vld [vmem:[%s149_s2] ss:$0 sm:$0xff] }
   0x4   :  { %89 = vmatpush3.bf16.msra.mxu0 %v23_v4  ;;  %v17_v9 = vpack.c.bf16 %v16_v8, %v15_v7 }
   0x5   :  { %90 = vmatprep.subr.bf16.mxu0 %v98_v0 }
   0x8   :  { %91 = vmatpush3.bf16.msra.mxu0 %v22_v6 }
   0xb   :  { %93 = vmatmul.mubr.msk.bf16.vlgmr.msra.gmra.mxu0 %vm31_vm1, %v17_v9 }
  0xcb   :  { %v69_v11 = vpop.f32.mrf.mxu0 }
  0xcc   :  { %v70_v12 = vadd.f32 %v83_v10, %v69_v11 }
  0xcd   :  { %v94_v13 = vpop.f32.mrf.mxu0 }
  0xce   :  { %77 = vst.msk [vmem:[%s150_s3] sm:$0xff] %vm76_vm2, %v70_v12 }
  0xcf   :  { %v72_v14 = vpop.f32.mrf.mxu0 }
  0xd0   :  { %v73_v15 = vadd.f32 %v83_v10, %v72_v14 }
  0xd1   :  { %v95_v16 = vpop.f32.mrf.mxu0 }
  0xd2   :  { %78 = vst.msk [vmem:[%s150_s3 + $0x8] sm:$0xff] %vm76_vm2, %v73_v15 }

// kernel: _lambda_.29
= control target key start
LH: loop header
LB: loop body
LE: loop exit
PB: predicated region body
PF: predicated region fallthrough
CT: control target
= control target key end

     0   :  { %v236_v0 = vmov 0.0   ;;  %vm237_vm0 = vmmov 0   ;;  %vm37_vm1 = vcmask 261120   ;;  %vm102_vm2 = vcmask 523264   ;;  %s335_s1 = inlined_call_operand.vmem [shape: f32[32,64], index: 1, kind: input, shape index: {}]   ;;  %s336_s3 = inlined_call_operand.vmem [shape: f32[64,32], index: 3, kind: input, shape index: {}]   ;;  %s337_s0 = inlined_call_operand.vmem [shape: f32[16,32], index: 0, kind: input, shape index: {}]   ;;  %s338_s2 = inlined_call_operand.vmem [shape: f32[1,64], index: 2, kind: input, shape index: {}]   ;;  %s339_s4 = inlined_call_operand.vmem [shape: f32[3,32], index: 4, kind: input, shape index: {}]   ;;  %s340_s5 = inlined_call_operand.vmem [shape: f32[16,32], index: 5, kind: output, shape index: {}]  }
   0x1   :  { %210 = vmatprep.subr.bf16.mxu0 %v236_v0  ;;  %v26_v1 = vld [vmem:[%s335_s1 + $0x10] sm:$0xff]  ;;  %v27_v2 = vld [vmem:[%s335_s1 + $0x18] sm:$0xff]  ;;  %v24_v3 = vld [vmem:[%s335_s1] sm:$0xff]  ;;  %214 = vmatprep.mubr.msk.bf16.mxu0 %vm237_vm0, %v236_v0 }
   0x2   :  { %v29_v4 = vpack.c.bf16 %v27_v2, %v26_v1  ;;  %v25_v5 = vld [vmem:[%s335_s1 + $0x8] sm:$0xff]  ;;  %218 = vmatprep.subr.bf16.mxu1 %v236_v0  ;;  %226 = vmatprep.mubr.msk.bf16.mxu1 %vm237_vm0, %v236_v0  ;;  %v91_v6 = vld [vmem:[%s336_s3 + $0x30] sm:$0xff]  ;;  %v92_v7 = vld [vmem:[%s336_s3 + $0x38] sm:$0xff] }
   0x3   :  { %v28_v8 = vpack.c.bf16 %v25_v5, %v24_v3  ;;  %v21_v9 = vld [vmem:[%s337_s0] sm:$0xff]  ;;  %v22_v10 = vld [vmem:[%s337_s0 + $0x8] sm:$0xff]  ;;  %v96_v11 = vpack.c.bf16 %v92_v7, %v91_v6  ;;  %v87_v16 = vld [vmem:[%s336_s3 + $0x10] sm:$0xff] }
   0x4   :  { %211 = vmatpush3.bf16.msra.mxu0 %v29_v4  ;;  %v23_v12 = vpack.c.bf16 %v22_v10, %v21_v9  ;;  %v89_v13 = vld [vmem:[%s336_s3 + $0x20] sm:$0xff]  ;;  %v90_v14 = vld [vmem:[%s336_s3 + $0x28] sm:$0xff]  ;;  %v88_v17 = vld [vmem:[%s336_s3 + $0x18] sm:$0xff] }
   0x5   :  { %212 = vmatprep.subr.bf16.mxu0 %v236_v0  ;;  %219 = vmatpush3.bf16.msra.mxu1 %v96_v11  ;;  %v95_v15 = vpack.c.bf16 %v90_v14, %v89_v13  ;;  %v94_v18 = vpack.c.bf16 %v88_v17, %v87_v16  ;;  %v85_v19 = vld [vmem:[%s336_s3] sm:$0xff]  ;;  %v86_v20 = vld [vmem:[%s336_s3 + $0x8] sm:$0xff] }
   0x6   :  { %220 = vmatprep.subr.bf16.mxu1 %v236_v0  ;;  %v93_v21 = vpack.c.bf16 %v86_v20, %v85_v19  ;;  %v196_v22 = vld [vmem:[%s338_s2] ss:$0 sm:$0xff]  ;;  %v200_v60 = vld [vmem:[%s339_s4 + $0x1] ss:$0 sm:$0xff]  ;;  %v201_v62 = vld [vmem:[%s339_s4 + $0x2] ss:$0 sm:$0xff] }
   0x7   :  { %v198_v32 = vld [vmem:[%s339_s4] ss:$0 sm:$0xff] }
   0x8   :  { %213 = vmatpush3.bf16.msra.mxu0 %v28_v8 }
   0x9   :  { %221 = vmatpush3.bf16.msra.mxu1 %v95_v15 }
   0xa   :  { %222 = vmatprep.subr.bf16.mxu1 %v236_v0 }
   0xb   :  { %215 = vmatmul.mubr.msk.bf16.vlgmr.msra.gmra.mxu0 %vm37_vm1, %v23_v12 }
   0xd   :  { %223 = vmatpush3.bf16.msra.mxu1 %v94_v18 }
   0xe   :  { %224 = vmatprep.subr.bf16.mxu1 %v236_v0 }
  0x11   :  { %225 = vmatpush3.bf16.msra.mxu1 %v93_v21 }
  0xcb   :  { %v75_v23 = vpop.f32.mrf.mxu0 }
  0xcc   :  { %v76_v25 = vadd.f32 %v196_v22, %v75_v23 }
  0xcd   :  { %v216_v24 = vpop.f32.mrf.mxu0 }
  0xce   :  { %v82_v29 = vmax.f32 %v76_v25, 0.0 }
  0xcf   :  { %v78_v26 = vpop.f32.mrf.mxu0 }
  0xd0   :  { %v79_v27 = vadd.f32 %v196_v22, %v78_v26 }
  0xd1   :  { %v217_v28 = vpop.f32.mrf.mxu0 }
  0xd2   :  { %v83_v30 = vmax.f32 %v79_v27, 0.0 }
  0xd4   :  { %v84_v31 = vpack.c.bf16 %v83_v30, %v82_v29 }
  0xd6   :  { %227 = vmatmul.mubr.msk.bf16.vlgmr.msra.gmra.mxu1 %vm102_vm2, %v84_v31 }
 0x196   :  { %v140_v33 = vpop.f32.mrf.mxu1 }
 0x197   :  { %v141_v34 = vadd.f32 %v198_v32, %v140_v33 }
 0x198   :  { %v228_v35 = vpop.f32.mrf.mxu1 }
 0x199   :  { %v147_v36 = vadd.f32 %v141_v34, %v21_v9 }
 0x19a   :  { %v143_v37 = vpop.f32.mrf.mxu1 }
 0x19b   :  { %v144_v38 = vadd.f32 %v198_v32, %v143_v37  ;;  %v149_v39 = vsel %vm37_vm1, %v147_v36, 0.0 }
 0x19c   :  { %150 = vadd.xlane.f32.xlu0 %v149_v39  ;;  %v229_v40 = vpop.f32.mrf.mxu1 }
 0x19d   :  { %v148_v41 = vadd.f32 %v144_v38, %v22_v10 }
 0x19f   :  { %v152_v42 = vsel %vm37_vm1, %v148_v41, 0.0 }
 0x1a0   :  { %153 = vadd.xlane.f32.xlu0 %v152_v42 }
 0x225   :  { %v151_v43 = vpop.xlane.xlu0 %150 }
 0x226   :  { %v156_v44 = vmul.f32 0.03125, %v151_v43 }
 0x228   :  { %v158_v45 = vsub.f32 %v147_v36, %v156_v44 }
 0x229   :  { %v154_v46 = vpop.xlane.xlu0 %153 }
 0x22a   :  { %v157_v47 = vmul.f32 0.03125, %v154_v46  ;;  %v160_v48 = vmul.f32 %v158_v45, %v158_v45 }
 0x22c   :  { %v159_v49 = vsub.f32 %v148_v41, %v157_v47  ;;  %v162_v50 = vsel %vm37_vm1, %v160_v48, 0.0 }
 0x22d   :  { %163 = vadd.xlane.f32.xlu1 %v162_v50 }
 0x22e   :  { %v161_v51 = vmul.f32 %v159_v49, %v159_v49 }
 0x230   :  { %v165_v52 = vsel %vm37_vm1, %v161_v51, 0.0 }
 0x231   :  { %166 = vadd.xlane.f32.xlu1 %v165_v52 }
 0x2b6   :  { %v164_v53 = vpop.xlane.xlu1 %163 }
 0x2b7   :  { %v168_v54 = vmul.f32 0.03125, %v164_v53 }
 0x2b9   :  { %v170_v55 = vadd.f32 1e-05, %v168_v54 }
 0x2ba   :  { %v167_v56 = vpop.xlane.xlu1 %166 }
 0x2bb   :  { %232 = vrsqrt.f32 %v170_v55  ;;  %v169_v57 = vmul.f32 0.03125, %v167_v56 }
 0x2bd   :  { %v171_v58 = vadd.f32 1e-05, %v169_v57 }
 0x2bf   :  { %234 = vrsqrt.f32 %v171_v58 }
 0x2c8   :  { %v233_v59 = vpop.eup %232 }
 0x2c9   :  { %v174_v61 = vmul.f32 %v233_v59, %v158_v45 }
 0x2cb   :  { %v181_v63 = vmul.f32 %v200_v60, %v174_v61 }
 0x2cc   :  { %v235_v0 = vpop.eup %234 }
 0x2cd   :  { %v188_v1 = vadd.f32 %v201_v62, %v181_v63  ;;  %v175_v2 = vmul.f32 %v235_v0, %v159_v49 }
 0x2cf   :  { %190 = vst.msk [vmem:[%s340_s5] sm:$0xff] %vm37_vm1, %v188_v1  ;;  %v182_v3 = vmul.f32 %v200_v60, %v175_v2 }
 0x2d1   :  { %v189_v4 = vadd.f32 %v201_v62, %v182_v3 }
 0x2d3   :  { %191 = vst.msk [vmem:[%s340_s5 + $0x8] sm:$0xff] %vm37_vm1, %v189_v4 }

// kernel: _lambda_.34
= control target key start
LH: loop header
LB: loop body
LE: loop exit
PB: predicated region body
PF: predicated region fallthrough
CT: control target
= control target key end

     0   :  { %vm13_vm0 = vcmask 261120   ;;  %s106_s0 = inlined_call_operand.vmem [shape: f32[16,32], index: 0, kind: input, shape index: {}]   ;;  %s107_s1 = inlined_call_operand.vmem [shape: f32[2,32], index: 1, kind: input, shape index: {}]   ;;  %s108_s2 = inlined_call_operand.vmem [shape: f32[16,32], index: 2, kind: output, shape index: {}]  }
   0x1   :  { %v11_v0 = vld [vmem:[%s106_s0] sm:$0xff]  ;;  %v12_v1 = vld [vmem:[%s106_s0 + $0x8] sm:$0xff] }
   0x2   :  { %v14_v2 = vsel %vm13_vm0, %v11_v0, 0.0  ;;  %v17_v3 = vsel %vm13_vm0, %v12_v1, 0.0  ;;  %v61_v21 = vld [vmem:[%s107_s1] ss:$0 sm:$0xff]  ;;  %v62_v23 = vld [vmem:[%s107_s1 + $0x1] ss:$0 sm:$0xff] }
   0x3   :  { %15 = vadd.xlane.f32.xlu0 %v14_v2 }
   0x7   :  { %18 = vadd.xlane.f32.xlu0 %v17_v3 }
  0x8c   :  { %v16_v4 = vpop.xlane.xlu0 %15 }
  0x8d   :  { %v21_v5 = vmul.f32 0.03125, %v16_v4 }
  0x8f   :  { %v23_v6 = vsub.f32 %v11_v0, %v21_v5 }
  0x90   :  { %v19_v7 = vpop.xlane.xlu0 %18 }
  0x91   :  { %v22_v8 = vmul.f32 0.03125, %v19_v7  ;;  %v25_v9 = vmul.f32 %v23_v6, %v23_v6 }
  0x93   :  { %v24_v10 = vsub.f32 %v12_v1, %v22_v8  ;;  %v27_v11 = vsel %vm13_vm0, %v25_v9, 0.0 }
  0x94   :  { %28 = vadd.xlane.f32.xlu1 %v27_v11 }
  0x95   :  { %v26_v12 = vmul.f32 %v24_v10, %v24_v10 }
  0x97   :  { %v30_v13 = vsel %vm13_vm0, %v26_v12, 0.0 }
  0x98   :  { %31 = vadd.xlane.f32.xlu1 %v30_v13 }
 0x11d   :  { %v29_v14 = vpop.xlane.xlu1 %28 }
 0x11e   :  { %v33_v15 = vmul.f32 0.03125, %v29_v14 }
 0x120   :  { %v35_v16 = vadd.f32 1e-05, %v33_v15 }
 0x121   :  { %v32_v17 = vpop.xlane.xlu1 %31 }
 0x122   :  { %63 = vrsqrt.f32 %v35_v16  ;;  %v34_v18 = vmul.f32 0.03125, %v32_v17 }
 0x124   :  { %v36_v19 = vadd.f32 1e-05, %v34_v18 }
 0x126   :  { %65 = vrsqrt.f32 %v36_v19 }
 0x12f   :  { %v64_v20 = vpop.eup %63 }
 0x130   :  { %v39_v22 = vmul.f32 %v64_v20, %v23_v6 }
 0x132   :  { %v46_v24 = vmul.f32 %v61_v21, %v39_v22 }
 0x133   :  { %v66_v25 = vpop.eup %65 }
 0x134   :  { %v53_v26 = vadd.f32 %v62_v23, %v46_v24  ;;  %v40_v27 = vmul.f32 %v66_v25, %v24_v10 }
 0x136   :  { %55 = vst.msk [vmem:[%s108_s2] sm:$0xff] %vm13_vm0, %v53_v26  ;;  %v47_v28 = vmul.f32 %v61_v21, %v40_v27 }
 0x138   :  { %v54_v29 = vadd.f32 %v62_v23, %v47_v28 }
 0x13a   :  { %56 = vst.msk [vmem:[%s108_s2 + $0x8] sm:$0xff] %vm13_vm0, %v54_v29 }

// kernel: _lambda_.39
= control target key start
LH: loop header
LB: loop body
LE: loop exit
PB: predicated region body
PF: predicated region fallthrough
CT: control target
= control target key end

     0   :  { %v98_v0 = vmov 0.0   ;;  %vm99_vm0 = vmmov 0   ;;  %vm31_vm1 = vcmask 261120   ;;  %vm76_vm2 = vcmask 523264   ;;  %s147_s1 = inlined_call_operand.vmem [shape: f32[32,64], index: 1, kind: input, shape index: {}]   ;;  %s148_s0 = inlined_call_operand.vmem [shape: f32[16,32], index: 0, kind: input, shape index: {}]   ;;  %s149_s2 = inlined_call_operand.vmem [shape: f32[1,64], index: 2, kind: input, shape index: {}]   ;;  %s150_s3 = inlined_call_operand.vmem [shape: f32[16,64], index: 3, kind: output, shape index: {}]  }
   0x1   :  { %88 = vmatprep.subr.bf16.mxu0 %v98_v0  ;;  %v20_v1 = vld [vmem:[%s147_s1 + $0x10] sm:$0xff]  ;;  %v21_v2 = vld [vmem:[%s147_s1 + $0x18] sm:$0xff]  ;;  %v18_v3 = vld [vmem:[%s147_s1] sm:$0xff]  ;;  %92 = vmatprep.mubr.msk.bf16.mxu0 %vm99_vm0, %v98_v0 }
   0x2   :  { %v23_v4 = vpack.c.bf16 %v21_v2, %v20_v1  ;;  %v19_v5 = vld [vmem:[%s147_s1 + $0x8] sm:$0xff]  ;;  %v15_v7 = vld [vmem:[%s148_s0] sm:$0xff] }
   0x3   :  { %v22_v6 = vpack.c.bf16 %v19_v5, %v18_v3  ;;  %v16_v8 = vld [vmem:[%s148_s0 + $0x8] sm:$0xff]  ;;  %v83_v10 = vld [vmem:[%s149_s2] ss:$0 sm:$0xff] }
   0x4   :  { %89 = vmatpush3.bf16.msra.mxu0 %v23_v4  ;;  %v17_v9 = vpack.c.bf16 %v16_v8, %v15_v7 }
   0x5   :  { %90 = vmatprep.subr.bf16.mxu0 %v98_v0 }
   0x8   :  { %91 = vmatpush3.bf16.msra.mxu0 %v22_v6 }
   0xb   :  { %93 = vmatmul.mubr.msk.bf16.vlgmr.msra.gmra.mxu0 %vm31_vm1, %v17_v9 }
  0xcb   :  { %v69_v11 = vpop.f32.mrf.mxu0 }
  0xcc   :  { %v70_v12 = vadd.f32 %v83_v10, %v69_v11 }
  0xcd   :  { %v94_v13 = vpop.f32.mrf.mxu0 }
  0xce   :  { %77 = vst.msk [vmem:[%s150_s3] sm:$0xff] %vm76_vm2, %v70_v12 }
  0xcf   :  { %v72_v14 = vpop.f32.mrf.mxu0 }
  0xd0   :  { %v73_v15 = vadd.f32 %v83_v10, %v72_v14 }
  0xd1   :  { %v95_v16 = vpop.f32.mrf.mxu0 }
  0xd2   :  { %78 = vst.msk [vmem:[%s150_s3 + $0x8] sm:$0xff] %vm76_vm2, %v73_v15 }

// kernel: _lambda_.51
= control target key start
LH: loop header
LB: loop body
LE: loop exit
PB: predicated region body
PF: predicated region fallthrough
CT: control target
= control target key end

     0   :  { %vm14_vm0 = vcmask 261120   ;;  %s144_s0 = inlined_call_operand.vmem [shape: f32[16,32], index: 0, kind: input, shape index: {}]   ;;  %s145_s1 = inlined_call_operand.vmem [shape: f32[2,32], index: 1, kind: input, shape index: {}]   ;;  %s146_s2 = inlined_call_operand.hbm [shape: f32[16,32], index: 2, kind: output, shape index: {}]  }
   0x1   :  { %v12_v0 = vld [vmem:[%s144_s0] sm:$0xff]  ;;  %v13_v1 = vld [vmem:[%s144_s0 + $0x8] sm:$0xff] }
   0x2   :  { %7 = vsyncpa [#allocation3], 0  ;;  %v15_v2 = vsel %vm14_vm0, %v12_v0, 0.0  ;;  %v18_v3 = vsel %vm14_vm0, %v13_v1, 0.0  ;;  %v74_v21 = vld [vmem:[%s145_s1] ss:$0 sm:$0xff] }
   0x3   :  { %16 = vadd.xlane.f32.xlu0 %v15_v2  ;;  %v75_v23 = vld [vmem:[%s145_s1 + $0x1] ss:$0 sm:$0xff]  ;;  %s105_s16 = smov [#allocation2]  }
   0x4   :  { %s63_s17 = sshll.u32 %s105_s16, 4  ;;  %s64_s17 = int_to_ptr.vmem [resolvable:$true] %s63_s17 }
   0x5   :  { %s83_s18 = scalar_lea.vmem %s64_s17, 256  ;;  %p88_p1 = scmp.lt.s32.totalorder %s64_s17, %s64_s17 }
   0x6   :  { %p84_p0 = scmp.ne.s32.totalorder %s64_s17, %s83_s18  ;;  %p89_p2 = scmp.lt.s32.totalorder %s83_s18, %s83_s18 }
   0x7   :  { %19 = vadd.xlane.f32.xlu0 %v18_v3 }
   0x8   :  { %p90_p3 = por %p89_p2, %p88_p1 }
   0xa   :  { %p91_p4 = pnand %p90_p3, %p84_p0 }
  0x8c   :  { %v17_v4 = vpop.xlane.xlu0 %16 }
  0x8d   :  { %v22_v5 = vmul.f32 0.03125, %v17_v4 }
  0x8f   :  { %v24_v6 = vsub.f32 %v12_v0, %v22_v5 }
  0x90   :  { %v20_v7 = vpop.xlane.xlu0 %19 }
  0x91   :  { %v23_v8 = vmul.f32 0.03125, %v20_v7  ;;  %v26_v9 = vmul.f32 %v24_v6, %v24_v6 }
  0x93   :  { %v25_v10 = vsub.f32 %v13_v1, %v23_v8  ;;  %v28_v11 = vsel %vm14_vm0, %v26_v9, 0.0 }
  0x94   :  { %29 = vadd.xlane.f32.xlu1 %v28_v11 }
  0x95   :  { %v27_v12 = vmul.f32 %v25_v10, %v25_v10 }
  0x97   :  { %v31_v13 = vsel %vm14_vm0, %v27_v12, 0.0 }
  0x98   :  { %32 = vadd.xlane.f32.xlu1 %v31_v13 }
 0x11d   :  { %v30_v14 = vpop.xlane.xlu1 %29 }
 0x11e   :  { %v34_v15 = vmul.f32 0.03125, %v30_v14 }
 0x120   :  { %v36_v16 = vadd.f32 1e-05, %v34_v15 }
 0x121   :  { %v33_v17 = vpop.xlane.xlu1 %32 }
 0x122   :  { %79 = vrsqrt.f32 %v36_v16  ;;  %v35_v18 = vmul.f32 0.03125, %v33_v17 }
 0x124   :  { %v37_v19 = vadd.f32 1e-05, %v35_v18 }
 0x126   :  { %81 = vrsqrt.f32 %v37_v19 }
 0x12f   :  { %v80_v20 = vpop.eup %79 }
 0x130   :  { %v40_v22 = vmul.f32 %v80_v20, %v24_v6 }
 0x132   :  { %v47_v24 = vmul.f32 %v74_v21, %v40_v22 }
 0x133   :  { %v82_v25 = vpop.eup %81 }
 0x134   :  { %v41_v26 = vmul.f32 %v82_v25, %v25_v10  ;;  %v54_v27 = vadd.f32 %v75_v23, %v47_v24 }
 0x136   :  { %v48_v28 = vmul.f32 %v74_v21, %v41_v26  ;;  %56 = vst.msk [vmem:[#allocation2] sm:$0xff] %vm14_vm0, %v54_v27 }
 0x138   :  { %v55_v29 = vadd.f32 %v75_v23, %v48_v28 }
 0x13a   :  { %57 = vst.msk [vmem:[#allocation2 + $0x8] sm:$0xff] %vm14_vm0, %v55_v29 }
 0x13b   :  { %94 = shalt.err (!%p91_p4)
}
 0x13c   :  { %s106_s1 = smov 128   ;;  %s107_s19 = smov 8  }
 0x13d   :  { %69 = dma.vmem_to_hbm [thread:$0]  %s64_s17, 256, %s146_s2, [#allocation3], %s106_s1, %s106_s1, %s107_s19  }
 0x13e   :  { %103 = dma.done.wait [#allocation3], 256  }
 0x13f   :  { %104 = vsyncadd [#allocation3], 4294967040 }
 0x140   :  { %73 = vsyncpa [#allocation3], 1 }

</bundles_post_ra>
